<compile_context>
chip_gen: v5e
topology: v5e:2x2
jax: 0.10.0
libtpu: 0.0.40
codegen_flags: <defaults>
</compile_context>

<pallas_src>
import functools

import jax
import jax.numpy as jnp
from jax.experimental import pallas as pl
from jax.experimental.pallas import tpu as pltpu

NUM_PATCHES = 176
FEAT = 512
K = 8                      # attention k (must divide 176; the reference's 32 does not)
PPG = NUM_PATCHES // K     # 22 patches per group


def attention_kernel(watt_ref, x_ref, out_ref):
    # ---- softmax over patches_per_group (axis 1); tiny, hidden under the x DMA ----
    w = watt_ref[...]                                    # (K, PPG)
    w = w - jnp.max(w, axis=1, keepdims=True)
    e = jnp.exp(w)
    probs = e / jnp.sum(e, axis=1, keepdims=True)        # (K, PPG)

    # ---- grouped weighted sum: out[:, g, :] = sum_p probs[g, p] * x[:, g, p, :] ----
    # Per-group loop keeps VPU temporaries at ~tile_b*PPG*FEAT f32; results are
    # collected and written with ONE dense full-block store (no masked vst.msk).
    groups = []
    for g in range(K):                                   # static, unrolled
        xg = x_ref[:, g]                                 # (tile_b, PPG, FEAT)
        pg = probs[g][None, :, None]                     # (1, PPG, 1)
        groups.append(jnp.sum(xg * pg, axis=1))          # (tile_b, FEAT)
    out_ref[...] = jnp.stack(groups, axis=1).astype(out_ref.dtype)


def _vmem_capacity_bytes():
    try:
        return int(pltpu.get_tpu_info().vmem_capacity_bytes)
    except Exception:
        return 64 * 1024 * 1024                          # conservative (v7x-sized)


def _select_tiling(batch, tile_b):
    """Pick (tile_b, vmem_limit_bytes) for the current chip generation."""
    vmem = _vmem_capacity_bytes()
    if tile_b is None:
        # 128 MiB VMEM chips (v5e/v6e): bigger tiles amortize per-step overhead.
        # 64 MiB VMEM chips (v7x): keep the double-buffered working set safe.
        tile_b = 96 if vmem >= 100 * 1024 * 1024 else 48
    if batch > 1:
        # >= 2 grid steps so the ("parallel",) axis can use both v7x TensorCores.
        tile_b = min(tile_b, pl.cdiv(batch, 2))
    tile_b = max(1, min(tile_b, max(batch, 1)))

    # VMEM budget: 2 double-buffered x tiles (PPG pads 22->24 sublanes for f32),
    # 2 output buffers, resident weights, plus elementwise-temporary slack.
    x_buf = tile_b * K * 24 * FEAT * 4
    o_buf = tile_b * K * FEAT * 4
    vmem_limit = 2 * x_buf + 2 * o_buf + 6 * 1024 * 1024
    vmem_limit = int(min(vmem_limit, int(vmem * 0.875)))
    vmem_limit = max(vmem_limit, 16 * 1024 * 1024)
    return tile_b, vmem_limit


@functools.partial(jax.jit, static_argnames=("tile_b", "vmem_limit"))
def _attention_pallas(x, attention_weights, *, tile_b, vmem_limit):
    B = x.shape[0]
    x4 = x.reshape(B, K, PPG, FEAT)                      # glue reshape outside kernel
    grid_steps = pl.cdiv(B, tile_b)

    cost = pl.CostEstimate(
        flops=2 * B * NUM_PATCHES * FEAT,
        transcendentals=grid_steps * K * PPG,
        bytes_accessed=B * (NUM_PATCHES * FEAT + K * FEAT) * 4 + K * PPG * 4,
    )

    return pl.pallas_call(
        attention_kernel,
        out_shape=jax.ShapeDtypeStruct((B, K, FEAT), jnp.float32),
        grid=(grid_steps,),
        in_specs=[
            # attention weights: constant block index -> fetched once, resident
            pl.BlockSpec((K, PPG), lambda i: (0, 0)),
            # x: streamed per batch tile, auto double-buffered; last block may be
            # ragged (leading dim only; minor dims PPG/FEAT are full/aligned).
            pl.BlockSpec((tile_b, K, PPG, FEAT), lambda i: (i, 0, 0, 0)),
        ],
        out_specs=pl.BlockSpec((tile_b, K, FEAT), lambda i: (i, 0, 0)),
        compiler_params=pltpu.CompilerParams(
            dimension_semantics=("parallel",),           # megacore on v7x
            vmem_limit_bytes=vmem_limit,
        ),
        cost_estimate=cost,
    )(attention_weights, x4)


def attention_forward(x, attention_weights, *, tile_b=None):
    """x: (B, 176, 512) f32, attention_weights: (K, PPG) f32 -> (B, K, 512) f32."""
    B = x.shape[0]
    if B == 0:
        return jnp.zeros((0, K, FEAT), jnp.float32)
    tb, vmem_limit = _select_tiling(B, tile_b)
    return _attention_pallas(x, attention_weights, tile_b=tb, vmem_limit=vmem_limit)


if __name__ == "__main__":
    key = jax.random.PRNGKey(0)
    kx, kw = jax.random.split(key)

    B = 5  # small demo batch; tile_b=2 -> grid=(3,), ragged last block exercised
    x = jax.random.normal(kx, (B, NUM_PATCHES, FEAT), jnp.float32)
    watt = jax.random.normal(kw, (K, PPG), jnp.float32)

    out = attention_forward(x, watt, tile_b=2)
    out = jax.block_until_ready(out)

    # Also exercise the chip-aware default tiling path once.
    out_default = jax.block_until_ready(attention_forward(x, watt))

    # pure-JAX reference of the PyTorch forward (eval semantics)
    probs = jax.nn.softmax(watt, axis=1)                             # (K, PPG)
    ref = (x.reshape(B, K, PPG, FEAT) * probs[None, :, :, None]).sum(axis=2)

    assert out.shape == (B, K, FEAT), out.shape
    assert jnp.allclose(out, ref, atol=1e-4, rtol=1e-4), float(jnp.max(jnp.abs(out - ref)))
    assert jnp.allclose(out_default, ref, atol=1e-4, rtol=1e-4), float(
        jnp.max(jnp.abs(out_default - ref)))
    print("KERNEL_OK")
</pallas_src>

<mosaic_0001>
module attributes {stable_mosaic.version = 11 : i64} {
  func.func @attention_kernel(%arg0: i32, %arg1: memref<8x22xf32, #tpu.memory_space<vmem>>, %arg2: memref<2x8x22x512xf32, #tpu.memory_space<vmem>>, %arg3: memref<2x8x512xf32, #tpu.memory_space<vmem>>) attributes {dimension_semantics = [#tpu.dimension_semantics<parallel>], iteration_bounds = array<i64: 3>, scalar_prefetch = 0 : i64, scratch_operands = 0 : i64, tpu.core_type = #tpu.core_type<tc>, window_params = [{pipeline_mode = #tpu.pipeline_mode<synchronous>, transform_indices = @transform_0, window_bounds = array<i64: 8, 22>}, {transform_indices = @transform_1, window_bounds = array<i64: 2, 8, 22, 512>}, {transform_indices = @transform_2, window_bounds = array<i64: 2, 8, 512>}]} {
    %c0 = arith.constant 0 : index
    %c0_0 = arith.constant 0 : index
    %0 = vector.load %arg1[%c0, %c0_0] : memref<8x22xf32, #tpu.memory_space<vmem>>, vector<8x22xf32>
    %cst = arith.constant dense<0xFF800000> : vector<8xf32>
    %1 = vector.multi_reduction <maximumf>, %0, %cst [1] : vector<8x22xf32> to vector<8xf32>
    %2 = vector.shape_cast %1 : vector<8xf32> to vector<8x1xf32>
    %3 = vector.broadcast %2 : vector<8x1xf32> to vector<8x22xf32>
    %4 = arith.subf %0, %3 : vector<8x22xf32>
    %5 = math.exp %4 : vector<8x22xf32>
    %cst_1 = arith.constant dense<0.000000e+00> : vector<8xf32>
    %6 = vector.multi_reduction <add>, %5, %cst_1 [1] : vector<8x22xf32> to vector<8xf32>
    %7 = vector.shape_cast %6 : vector<8xf32> to vector<8x1xf32>
    %8 = vector.broadcast %7 : vector<8x1xf32> to vector<8x22xf32>
    %9 = arith.divf %5, %8 : vector<8x22xf32>
    %c0_2 = arith.constant 0 : index
    %c0_3 = arith.constant 0 : index
    %c0_4 = arith.constant 0 : index
    %c0_5 = arith.constant 0 : index
    %10 = vector.load %arg2[%c0_2, %c0_3, %c0_4, %c0_5] : memref<2x8x22x512xf32, #tpu.memory_space<vmem>>, vector<2x1x22x512xf32>
    %11 = vector.shape_cast %10 : vector<2x1x22x512xf32> to vector<2x22x512xf32>
    %12 = vector.extract_strided_slice %9 {offsets = [0, 0], sizes = [1, 22], strides = [1, 1]} : vector<8x22xf32> to vector<1x22xf32>
    %13 = vector.shape_cast %12 : vector<1x22xf32> to vector<22xf32>
    %14 = vector.shape_cast %13 : vector<22xf32> to vector<1x22x1xf32>
    %15 = vector.broadcast %14 : vector<1x22x1xf32> to vector<2x22x512xf32>
    %16 = arith.mulf %11, %15 : vector<2x22x512xf32>
    %cst_6 = arith.constant dense<0.000000e+00> : vector<2x512xf32>
    %17 = vector.multi_reduction <add>, %16, %cst_6 [1] : vector<2x22x512xf32> to vector<2x512xf32>
    %c0_7 = arith.constant 0 : index
    %c1 = arith.constant 1 : index
    %c0_8 = arith.constant 0 : index
    %c0_9 = arith.constant 0 : index
    %18 = vector.load %arg2[%c0_7, %c1, %c0_8, %c0_9] : memref<2x8x22x512xf32, #tpu.memory_space<vmem>>, vector<2x1x22x512xf32>
    %19 = vector.shape_cast %18 : vector<2x1x22x512xf32> to vector<2x22x512xf32>
    %20 = vector.extract_strided_slice %9 {offsets = [1, 0], sizes = [1, 22], strides = [1, 1]} : vector<8x22xf32> to vector<1x22xf32>
    %21 = vector.shape_cast %20 : vector<1x22xf32> to vector<22xf32>
    %22 = vector.shape_cast %21 : vector<22xf32> to vector<1x22x1xf32>
    %23 = vector.broadcast %22 : vector<1x22x1xf32> to vector<2x22x512xf32>
    %24 = arith.mulf %19, %23 : vector<2x22x512xf32>
    %cst_10 = arith.constant dense<0.000000e+00> : vector<2x512xf32>
    %25 = vector.multi_reduction <add>, %24, %cst_10 [1] : vector<2x22x512xf32> to vector<2x512xf32>
    %c0_11 = arith.constant 0 : index
    %c2 = arith.constant 2 : index
    %c0_12 = arith.constant 0 : index
    %c0_13 = arith.constant 0 : index
    %26 = vector.load %arg2[%c0_11, %c2, %c0_12, %c0_13] : memref<2x8x22x512xf32, #tpu.memory_space<vmem>>, vector<2x1x22x512xf32>
    %27 = vector.shape_cast %26 : vector<2x1x22x512xf32> to vector<2x22x512xf32>
    %28 = vector.extract_strided_slice %9 {offsets = [2, 0], sizes = [1, 22], strides = [1, 1]} : vector<8x22xf32> to vector<1x22xf32>
    %29 = vector.shape_cast %28 : vector<1x22xf32> to vector<22xf32>
    %30 = vector.shape_cast %29 : vector<22xf32> to vector<1x22x1xf32>
    %31 = vector.broadcast %30 : vector<1x22x1xf32> to vector<2x22x512xf32>
    %32 = arith.mulf %27, %31 : vector<2x22x512xf32>
    %cst_14 = arith.constant dense<0.000000e+00> : vector<2x512xf32>
    %33 = vector.multi_reduction <add>, %32, %cst_14 [1] : vector<2x22x512xf32> to vector<2x512xf32>
    %c0_15 = arith.constant 0 : index
    %c3 = arith.constant 3 : index
    %c0_16 = arith.constant 0 : index
    %c0_17 = arith.constant 0 : index
    %34 = vector.load %arg2[%c0_15, %c3, %c0_16, %c0_17] : memref<2x8x22x512xf32, #tpu.memory_space<vmem>>, vector<2x1x22x512xf32>
    %35 = vector.shape_cast %34 : vector<2x1x22x512xf32> to vector<2x22x512xf32>
    %36 = vector.extract_strided_slice %9 {offsets = [3, 0], sizes = [1, 22], strides = [1, 1]} : vector<8x22xf32> to vector<1x22xf32>
    %37 = vector.shape_cast %36 : vector<1x22xf32> to vector<22xf32>
    %38 = vector.shape_cast %37 : vector<22xf32> to vector<1x22x1xf32>
    %39 = vector.broadcast %38 : vector<1x22x1xf32> to vector<2x22x512xf32>
    %40 = arith.mulf %35, %39 : vector<2x22x512xf32>
    %cst_18 = arith.constant dense<0.000000e+00> : vector<2x512xf32>
    %41 = vector.multi_reduction <add>, %40, %cst_18 [1] : vector<2x22x512xf32> to vector<2x512xf32>
    %c0_19 = arith.constant 0 : index
    %c4 = arith.constant 4 : index
    %c0_20 = arith.constant 0 : index
    %c0_21 = arith.constant 0 : index
    %42 = vector.load %arg2[%c0_19, %c4, %c0_20, %c0_21] : memref<2x8x22x512xf32, #tpu.memory_space<vmem>>, vector<2x1x22x512xf32>
    %43 = vector.shape_cast %42 : vector<2x1x22x512xf32> to vector<2x22x512xf32>
    %44 = vector.extract_strided_slice %9 {offsets = [4, 0], sizes = [1, 22], strides = [1, 1]} : vector<8x22xf32> to vector<1x22xf32>
    %45 = vector.shape_cast %44 : vector<1x22xf32> to vector<22xf32>
    %46 = vector.shape_cast %45 : vector<22xf32> to vector<1x22x1xf32>
    %47 = vector.broadcast %46 : vector<1x22x1xf32> to vector<2x22x512xf32>
    %48 = arith.mulf %43, %47 : vector<2x22x512xf32>
    %cst_22 = arith.constant dense<0.000000e+00> : vector<2x512xf32>
    %49 = vector.multi_reduction <add>, %48, %cst_22 [1] : vector<2x22x512xf32> to vector<2x512xf32>
    %c0_23 = arith.constant 0 : index
    %c5 = arith.constant 5 : index
    %c0_24 = arith.constant 0 : index
    %c0_25 = arith.constant 0 : index
    %50 = vector.load %arg2[%c0_23, %c5, %c0_24, %c0_25] : memref<2x8x22x512xf32, #tpu.memory_space<vmem>>, vector<2x1x22x512xf32>
    %51 = vector.shape_cast %50 : vector<2x1x22x512xf32> to vector<2x22x512xf32>
    %52 = vector.extract_strided_slice %9 {offsets = [5, 0], sizes = [1, 22], strides = [1, 1]} : vector<8x22xf32> to vector<1x22xf32>
    %53 = vector.shape_cast %52 : vector<1x22xf32> to vector<22xf32>
    %54 = vector.shape_cast %53 : vector<22xf32> to vector<1x22x1xf32>
    %55 = vector.broadcast %54 : vector<1x22x1xf32> to vector<2x22x512xf32>
    %56 = arith.mulf %51, %55 : vector<2x22x512xf32>
    %cst_26 = arith.constant dense<0.000000e+00> : vector<2x512xf32>
    %57 = vector.multi_reduction <add>, %56, %cst_26 [1] : vector<2x22x512xf32> to vector<2x512xf32>
    %c0_27 = arith.constant 0 : index
    %c6 = arith.constant 6 : index
    %c0_28 = arith.constant 0 : index
    %c0_29 = arith.constant 0 : index
    %58 = vector.load %arg2[%c0_27, %c6, %c0_28, %c0_29] : memref<2x8x22x512xf32, #tpu.memory_space<vmem>>, vector<2x1x22x512xf32>
    %59 = vector.shape_cast %58 : vector<2x1x22x512xf32> to vector<2x22x512xf32>
    %60 = vector.extract_strided_slice %9 {offsets = [6, 0], sizes = [1, 22], strides = [1, 1]} : vector<8x22xf32> to vector<1x22xf32>
    %61 = vector.shape_cast %60 : vector<1x22xf32> to vector<22xf32>
    %62 = vector.shape_cast %61 : vector<22xf32> to vector<1x22x1xf32>
    %63 = vector.broadcast %62 : vector<1x22x1xf32> to vector<2x22x512xf32>
    %64 = arith.mulf %59, %63 : vector<2x22x512xf32>
    %cst_30 = arith.constant dense<0.000000e+00> : vector<2x512xf32>
    %65 = vector.multi_reduction <add>, %64, %cst_30 [1] : vector<2x22x512xf32> to vector<2x512xf32>
    %c0_31 = arith.constant 0 : index
    %c7 = arith.constant 7 : index
    %c0_32 = arith.constant 0 : index
    %c0_33 = arith.constant 0 : index
    %66 = vector.load %arg2[%c0_31, %c7, %c0_32, %c0_33] : memref<2x8x22x512xf32, #tpu.memory_space<vmem>>, vector<2x1x22x512xf32>
    %67 = vector.shape_cast %66 : vector<2x1x22x512xf32> to vector<2x22x512xf32>
    %68 = vector.extract_strided_slice %9 {offsets = [7, 0], sizes = [1, 22], strides = [1, 1]} : vector<8x22xf32> to vector<1x22xf32>
    %69 = vector.shape_cast %68 : vector<1x22xf32> to vector<22xf32>
    %70 = vector.shape_cast %69 : vector<22xf32> to vector<1x22x1xf32>
    %71 = vector.broadcast %70 : vector<1x22x1xf32> to vector<2x22x512xf32>
    %72 = arith.mulf %67, %71 : vector<2x22x512xf32>
    %cst_34 = arith.constant dense<0.000000e+00> : vector<2x512xf32>
    %73 = vector.multi_reduction <add>, %72, %cst_34 [1] : vector<2x22x512xf32> to vector<2x512xf32>
    %74 = vector.shape_cast %17 : vector<2x512xf32> to vector<2x1x512xf32>
    %75 = vector.shape_cast %25 : vector<2x512xf32> to vector<2x1x512xf32>
    %76 = vector.shape_cast %33 : vector<2x512xf32> to vector<2x1x512xf32>
    %77 = vector.shape_cast %41 : vector<2x512xf32> to vector<2x1x512xf32>
    %78 = vector.shape_cast %49 : vector<2x512xf32> to vector<2x1x512xf32>
    %79 = vector.shape_cast %57 : vector<2x512xf32> to vector<2x1x512xf32>
    %80 = vector.shape_cast %65 : vector<2x512xf32> to vector<2x1x512xf32>
    %81 = vector.shape_cast %73 : vector<2x512xf32> to vector<2x1x512xf32>
    %82 = tpu.concatenate %74, %75, %76, %77, %78, %79, %80, %81 in 1 : vector<2x1x512xf32>, vector<2x1x512xf32>, vector<2x1x512xf32>, vector<2x1x512xf32>, vector<2x1x512xf32>, vector<2x1x512xf32>, vector<2x1x512xf32>, vector<2x1x512xf32> -> vector<2x8x512xf32>
    %c0_35 = arith.constant 0 : index
    %c0_36 = arith.constant 0 : index
    %c0_37 = arith.constant 0 : index
    %83 = vector.load %arg3[%c0_35, %c0_36, %c0_37] : memref<2x8x512xf32, #tpu.memory_space<vmem>>, vector<2x8x512xf32>
    tpu.vector_store %arg3[%c0_35, %c0_36, %c0_37], %82 {strides = array<i32>} : memref<2x8x512xf32, #tpu.memory_space<vmem>>, vector<2x8x512xf32>,
    return
  }
  func.func @transform_0(%arg0: i32) -> (i32, i32) {
    %c0_i32 = arith.constant 0 : i32
    %c0_i32_0 = arith.constant 0 : i32
    %c0_i32_1 = arith.constant 0 : i32
    return %c0_i32, %c0_i32_0 : i32, i32
  }
  func.func @transform_1(%arg0: i32) -> (i32, i32, i32, i32) {
    %c0_i32 = arith.constant 0 : i32
    %c0_i32_0 = arith.constant 0 : i32
    %c0_i32_1 = arith.constant 0 : i32
    %c0_i32_2 = arith.constant 0 : i32
    return %arg0, %c0_i32, %c0_i32_0, %c0_i32_1 : i32, i32, i32, i32
  }
  func.func @transform_2(%arg0: i32) -> (i32, i32, i32) {
    %c0_i32 = arith.constant 0 : i32
    %c0_i32_0 = arith.constant 0 : i32
    %c0_i32_1 = arith.constant 0 : i32
    return %arg0, %c0_i32, %c0_i32_0 : i32, i32, i32
  }
}

</mosaic_0001>

<bundles_post_ra>
// kernel: _attention_pallas.1
= control target key start
LH: loop header
LB: loop body
LE: loop exit
PB: predicated region body
PF: predicated region fallthrough
CT: control target
= control target key end

     0   :  { %7 = vsyncpa [#allocation3], 0  ;;  %s2924_s0 = inlined_call_operand.vmem [shape: f32[8,22], index: 0, kind: input, shape index: {}]   ;;  %s2925_s1 = inlined_call_operand.vmem [shape: f32[5,8,22,512], index: 1, kind: input, shape index: {}]   ;;  %s2926_s2 = inlined_call_operand.hbm [shape: f32[5,8,512], index: 2, kind: output, shape index: {}]  }
   0x1   :  { %9 = vsyncpa [#allocation3 + $0x1], 0  ;;  %s1837_s9 = smov 0   ;;  %s1839_s10 = smov 0  }
   0x2   :  { %s1841_s11 = smov 0   ;;  %s1843_s12 = smov 0  }
   0x3 LB: > { %s1858_s13 = sadd.s32 4294967295, %s1817_s12   ;;  %s1491_s14 = sadd.s32 4294967294, %s1817_s12   ;;  %s1817_s12 = sphi %s1843_s12, %s2986_s12   ;;  %s1813_s11 = sphi %s1841_s11, %s2985_s11   ;;  %s1809_s10 = sphi %s1839_s10, %s2984_s10   ;;  %s1805_s9 = sphi %s1837_s9, %s2983_s9  }
   0x4   : > { %s1862_s15 = sadd.s32 1, %s1817_s12   ;;  %s69_s16 = sadd.s32 1, %s1813_s11 }
   0x5   : > { %s66_s17 = ssub.s32 %s1817_s12, %s1862_s15  ;;  %p79_p0 = scmp.ne.s32.totalorder %s1813_s11, %s1809_s10 }
   0x6   : > { %p67_p1 = scmp.eq.s32.totalorder %s66_s17, 0  ;;  %p80_p2 = scmp.eq.s32.totalorder %s1858_s13, 2 }
   0x7   : > { %p85_p3 = scmp.ne.s32.totalorder %s1809_s10, %s1805_s9  ;;  %p86_p4 = scmp.eq.s32.totalorder %s1491_s14, 2 }
   0x8   : > { %s1873_s18 = scalar_select %p67_p1, %s1813_s11, %s69_s16  }
   0x9   : > { %p1875_p5 = por %p80_p2, %p79_p0  ;;  %p1879_p6 = por %p86_p4, %p85_p3 }
   0xa   : > { %p1494_p7 = scmp.ge.s32.totalorder %s1817_s12, 1  ;;  %p131_p8 = scmp.lt.s32.totalorder %s1817_s12, 4 }
   0xc   : > { %p132_p9 = pnand %p1494_p7, %p131_p8 }
   0xe   : > { %135 = sbr.rel (%p132_p9) target bundleno = 646 (0x286), region = 28 }
  0x13   : > { %v188_v0 = vld [vmem:[%s2924_s0] sm:$0xff]  ;;  %vm189_vm0 = vcmask 179200   ;;  %v239_v7 = vlaneseq  ;;  %s1918_s23 = sshll.u32 %s1858_s13, 1  ;;  %vm282_vm5 = vcmask 1045504   ;;  %vm1334_vm6 = vcmask 1040384   ;;  %s158_s29 = sand.u32 1, %s1809_s10  }
  0x14   : > { %v190_v1 = vsel %vm189_vm0, %v188_v0, -inf  ;;  %p169_p10 = scmp.lt.s32.totalorder %s1918_s23, 4  ;;  %vm1343_vm7 = vcmask 1041408   ;;  %vm1352_vm8 = vcmask 1042432   ;;  %vm1361_vm9 = vcmask 1043456   ;;  %s1495_s30 = sshll.u32 %s158_s29, 6 }
  0x15   : > { %191 = vmax.xlane.f32.xlu0 %v190_v1  ;;  %v1888_v8 = vshrl.u32 %v239_v7, 7  ;;  %vm1370_vm10 = vcmask 1044480   ;;  %vm1387_vm11 = vcmask 1046528   ;;  %s2836_s3 = scalar_lea.vmem [#allocation2], %s1495_s30  ;;  %s2863_s4 = scalar_lea.sflag [#allocation3], %s158_s29 }
  0x16   : > { %s170_s24 = scalar_select %p169_p10, %s1918_s23, 4 }
  0x17   : > { %1721 = vset.pattern.permute.xlu1 %v1888_v8  ;;  %v1892_v9 = vadd.s32 16, %v1888_v8  ;;  %v247_v10 = vadd.s32 8, %v1888_v8  ;;  %s1413_s5 = ssub.s32 (%p1875_p5), 5, %s1918_s23 }
  0x18   : > { %s1680_s25 = smul.u32 768, %s170_s24  ;;  %p1414_p11 = scmp.lt.s32.totalorder (%p1875_p5), %s1413_s5, 2 }
  0x19   : > { %1723 = vset.pattern.permute.xlu2 %v1892_v9  ;;  %1725 = vset.pattern.permute.xlu0 %v247_v10 }
  0x1a   : > { %s1925_s28 = scalar_lea.vmem %s2925_s1, %s1680_s25 }
  0x1b   : > { %v222_v32 = vld [vmem:[%s1925_s28 + $0x40] sm:$0x3f]  ;;  %v223_v33 = vld [vmem:[%s1925_s28 + $0x48] sm:$0x3f]  ;;  %v224_v34 = vld [vmem:[%s1925_s28 + $0x50] sm:$0x3f] }
  0x1c   : > { %v225_v35 = vld [vmem:[%s1925_s28 + $0x58] sm:$0x3f]  ;;  %v234_v36 = vld [vmem:[%s1925_s28 + $0x340] sm:$0x3f]  ;;  %v235_v37 = vld [vmem:[%s1925_s28 + $0x348] sm:$0x3f] }
  0x1d   : > { %v236_v38 = vld [vmem:[%s1925_s28 + $0x350] sm:$0x3f]  ;;  %v237_v39 = vld [vmem:[%s1925_s28 + $0x358] sm:$0x3f]  ;;  %v1498_v49 = vld [vmem:[%s1925_s28 + $0x60] sm:$0xff] }
  0x1e   : > { %v1502_v51 = vld [vmem:[%s1925_s28 + $0x80] sm:$0xff]  ;;  %v1503_v52 = vld [vmem:[%s1925_s28 + $0x88] sm:$0xff]  ;;  %v1504_v53 = vld [vmem:[%s1925_s28 + $0x90] sm:$0xff] }
  0x1f   : > { %v1499_v55 = vld [vmem:[%s1925_s28 + $0x68] sm:$0xff]  ;;  %v1500_v56 = vld [vmem:[%s1925_s28 + $0x70] sm:$0xff]  ;;  %v1505_v57 = vld [vmem:[%s1925_s28 + $0x98] sm:$0xff] }
  0x20   : > { %v1514_v58 = vld [vmem:[%s1925_s28 + $0x380] sm:$0xff]  ;;  %v1515_v59 = vld [vmem:[%s1925_s28 + $0x388] sm:$0xff]  ;;  %v1517_v1 = vld [vmem:[%s1925_s28 + $0x398] sm:$0xff] }
  0x21   : > { %v1511_v7 = vld [vmem:[%s1925_s28 + $0x368] sm:$0xff] }
  0x88   : > { %v192_v2 = vpop.xlane.xlu0 %191 }
  0x89   : > { %v193_v3 = vsub.f32 %v188_v0, %v192_v2  ;;  %v1516_v0 = vld [vmem:[%s1925_s28 + $0x390] sm:$0xff] }
  0x8b   : > { %v194_v4 = vmul.f32 1.442695, %v193_v3 }
  0x8d   : > { %1740 = vpow2.f32 %v194_v4 }
  0x93   : > { %v1741_v5 = vpop.eup %1740 }
  0x94   : > { %v196_v6 = vsel %vm189_vm0, %v1741_v5, 0.0 }
  0x95   : > { %197 = vadd.xlane.f32.xlu0 %v196_v6  ;;  %v1510_v6 = vld [vmem:[%s1925_s28 + $0x360] sm:$0xff] }
 0x108   : > { %v198_v11 = vpop.xlane.xlu0 %197 }
 0x109   : > { %1742 = vrcp.f32 %v198_v11  ;;  %v210_v15 = vand.u32 2147483648, %v198_v11  ;;  %v208_v17 = vand.u32 2147483647, %v198_v11  ;;  %vm204_vm2 = vweird.f32 %v198_v11 }
 0x10b   : > { %v211_v19 = vor.u32 1.1754944e-38, %v210_v15  ;;  %vm209_vm4 = vcmp.eq.f32.partialorder %v208_v17, 8.507059e+37  ;;  %v1522_v17 = vld [vmem:[%s1925_s28 + $0xc0] sm:$0xff] }
 0x10f   : > { %v1743_v12 = vpop.eup %1742 }
 0x110   : > { %v200_v13 = vmul.f32 %v1743_v12, %v198_v11  ;;  %vm205_vm1 = vweird.f32 %v1743_v12  ;;  %v1512_v11 = vld [vmem:[%s1925_s28 + $0x370] sm:$0xff] }
 0x111   : > { %vm206_vm3 = vmor %vm204_vm2, %vm205_vm1 }
 0x112   : > { %v201_v14 = vsub.f32 1.0, %v200_v13 }
 0x114   : > { %v202_v16 = vmul.f32 %v1743_v12, %v201_v14 }
 0x116   : > { %v203_v18 = vadd.f32 %v1743_v12, %v202_v16 }
 0x118   : > { %v207_v20 = vsel %vm206_vm3, %v1743_v12, %v203_v18  ;;  %v1513_v12 = vld [vmem:[%s1925_s28 + $0x378] sm:$0xff] }
 0x119   : > { %v212_v21 = vsel %vm209_vm4, %v211_v19, %v207_v20 }
 0x11a   : > { %v1896_v22 = vmul.f32 %v1741_v5, %v212_v21  ;;  %v1501_v5 = vld [vmem:[%s1925_s28 + $0x78] sm:$0xff] }
 0x11c   : > { %v379_v23 = vperm.slane %v1896_v22, 1  ;;  %v238_v24 = vperm.slane %v1896_v22, 0  ;;  %v939_v25 = vperm.slane %v1896_v22, 5  ;;  %v519_v26 = vperm.slane %v1896_v22, 2 }
 0x11d   : > { %v1907_v27 = vperm.slane %v1896_v22, 6  ;;  %v659_v28 = vperm.slane %v1896_v22, 3  ;;  %v799_v29 = vperm.slane %v1896_v22, 4  ;;  %v1940_v48 = vperm.slane %v1896_v22, 7  ;;  %v1523_v22 = vld [vmem:[%s1925_s28 + $0xc8] sm:$0xff] }
 0x11e   : > { %390 = vperm.xlu0 %1725, %v379_v23   ;;  %255 = vperm.xlu2 %1723, %v238_v24  }
 0x11f   : > { %243 = vperm.xlu1 %1721, %v238_v24  }
 0x126   : > { %1735 = vset.pattern.permute.xlu0 %v1888_v8  ;;  %1724 = vset.pattern.permute.xlu2 %v1888_v8 }
 0x127   : > { %1722 = vset.pattern.permute.xlu1 %v247_v10 }
 0x12e   : > { %944 = vperm.xlu0 %1735, %v939_v25   ;;  %384 = vperm.xlu2 %1724, %v379_v23  }
 0x12f   : > { %249 = vperm.xlu1 %1722, %v238_v24   ;;  %v1525_v24 = vld [vmem:[%s1925_s28 + $0xd8] sm:$0xff] }
 0x136   : > { %1738 = vset.pattern.permute.xlu0 %v1892_v9  ;;  %524 = vperm.xlu2 %1724, %v519_v26  }
 0x137   : > { %1726 = vset.pattern.permute.xlu1 %v1892_v9 }
 0x13e   : > { %1096 = vperm.xlu0 %1738, %v1907_v27   ;;  %1728 = vset.pattern.permute.xlu2 %v1892_v9 }
 0x13f   : > { %396 = vperm.xlu1 %1726, %v379_v23   ;;  %v1524_v23 = vld [vmem:[%s1925_s28 + $0xd0] sm:$0xff] }
 0x146   : > { %536 = vperm.xlu2 %1728, %v519_v26  }
 0x147   : > { %1727 = vset.pattern.permute.xlu1 %v247_v10 }
 0x14e   : > { %1730 = vset.pattern.permute.xlu2 %v247_v10 }
 0x14f   : > { %530 = vperm.xlu1 %1727, %v519_v26  }
 0x156   : > { %670 = vperm.xlu2 %1730, %v659_v28  }
 0x157   : > { %1729 = vset.pattern.permute.xlu1 %v1888_v8 }
 0x15e   : > { %1732 = vset.pattern.permute.xlu2 %v1888_v8 }
 0x15f   : > { %664 = vperm.xlu1 %1729, %v659_v28  }
 0x166   : > { %804 = vperm.xlu2 %1732, %v799_v29  }
 0x167   : > { %1731 = vset.pattern.permute.xlu1 %v1892_v9 }
 0x16e   : > { %1734 = vset.pattern.permute.xlu2 %v1892_v9 }
 0x16f   : > { %676 = vperm.xlu1 %1731, %v659_v28  }
 0x176   : > { %816 = vperm.xlu2 %1734, %v799_v29  }
 0x177   : > { %1733 = vset.pattern.permute.xlu1 %v247_v10 }
 0x178   : > { %v256_v30 = vpop.permute.xlu2 %255 }
 0x179   : > { %v265_v40 = vmul.f32 %v256_v30, %v222_v32  ;;  %v266_v41 = vmul.f32 %v256_v30, %v223_v33  ;;  %v267_v42 = vmul.f32 %v256_v30, %v224_v34  ;;  %v268_v43 = vmul.f32 %v256_v30, %v225_v35  ;;  %v1536_v32 = vld [vmem:[%s1925_s28 + $0x3d0] sm:$0xff]  ;;  %v1537_v33 = vld [vmem:[%s1925_s28 + $0x3d8] sm:$0xff]  ;;  %v214_v34 = vld [vmem:[%s1925_s28] sm:$0xff] }
 0x17a   : > { %v277_v44 = vmul.f32 %v256_v30, %v234_v36  ;;  %v278_v45 = vmul.f32 %v256_v30, %v235_v37  ;;  %v279_v46 = vmul.f32 %v256_v30, %v236_v38  ;;  %v280_v47 = vmul.f32 %v256_v30, %v237_v39  ;;  %v1535_v30 = vld [vmem:[%s1925_s28 + $0x3c8] sm:$0xff] }
 0x17b   : > { %v1947_v54 = vsel %vm282_vm5, %v265_v40, 0.0  ;;  %v1956_v60 = vsel %vm282_vm5, %v266_v41, 0.0  ;;  %v1959_v61 = vsel %vm282_vm5, %v267_v42, 0.0  ;;  %v1962_v62 = vsel %vm282_vm5, %v268_v43, 0.0  ;;  %v215_v40 = vld [vmem:[%s1925_s28 + $0x8] sm:$0xff]  ;;  %v216_v41 = vld [vmem:[%s1925_s28 + $0x10] sm:$0xff] }
 0x17c   : > { %v1965_v63 = vsel %vm282_vm5, %v277_v44, 0.0  ;;  %v1971_v2 = vsel %vm282_vm5, %v278_v45, 0.0  ;;  %v1974_v3 = vsel %vm282_vm5, %v279_v46, 0.0  ;;  %v1977_v4 = vsel %vm282_vm5, %v280_v47, 0.0  ;;  %v217_v42 = vld [vmem:[%s1925_s28 + $0x18] sm:$0xff]  ;;  %v226_v43 = vld [vmem:[%s1925_s28 + $0x300] sm:$0xff] }
 0x17e   : > { %956 = vperm.xlu2 %1734, %v939_v25  }
 0x17f   : > { %810 = vperm.xlu1 %1733, %v799_v29  }
 0x186   : > { %1737 = vset.pattern.permute.xlu2 %v247_v10 }
 0x187   : > { %950 = vperm.xlu1 %1733, %v939_v25   ;;  %v1534_v25 = vld [vmem:[%s1925_s28 + $0x3c0] sm:$0xff] }
 0x188   : > { %v1927_v31 = vpop.permute.xlu2 %384 }
 0x189   : > { %v398_v18 = vmul.f32 %v1498_v49, %v1927_v31  ;;  %v399_v26 = vmul.f32 %v1499_v55, %v1927_v31  ;;  %v401_v28 = vmul.f32 %v1501_v5, %v1927_v31  ;;  %v410_v29 = vmul.f32 %v1510_v6, %v1927_v31  ;;  %v228_v49 = vld [vmem:[%s1925_s28 + $0x310] sm:$0xff]  ;;  %v1597_v6 = vld [vmem:[%s1925_s28 + $0x1f8] sm:$0xff] }
 0x18a   : > { %v411_v35 = vmul.f32 %v1511_v7, %v1927_v31  ;;  %v412_v36 = vmul.f32 %v1512_v11, %v1927_v31  ;;  %v413_v37 = vmul.f32 %v1513_v12, %v1927_v31  ;;  %v1606_v7 = vld [vmem:[%s1925_s28 + $0x4e0] sm:$0xff] }
 0x18e   : > { %1090 = vperm.xlu2 %1737, %v1907_v27  }
 0x18f   : > { %1736 = vset.pattern.permute.xlu1 %v1888_v8 }
 0x190   : > { %v391_v50 = vpop.permute.xlu0 %390  ;;  %v525_v10 = vpop.permute.xlu2 %524 }
 0x191   : > { %v402_v8 = vmul.f32 %v1502_v51, %v391_v50  ;;  %v403_v13 = vmul.f32 %v1503_v52, %v391_v50  ;;  %v404_v14 = vmul.f32 %v1504_v53, %v391_v50  ;;  %v405_v15 = vmul.f32 %v1505_v57, %v391_v50  ;;  %v244_v39 = vpop.permute.xlu1 %243  ;;  %v1595_v57 = vld [vmem:[%s1925_s28 + $0x1e8] sm:$0xff] }
 0x192   : > { %v414_v16 = vmul.f32 %v1514_v58, %v391_v50  ;;  %v415_v19 = vmul.f32 %v1515_v59, %v391_v50  ;;  %v416_v20 = vmul.f32 %v1516_v0, %v391_v50  ;;  %v417_v21 = vmul.f32 %v1517_v1, %v391_v50  ;;  %v229_v50 = vld [vmem:[%s1925_s28 + $0x318] sm:$0xff]  ;;  %v1596_v58 = vld [vmem:[%s1925_s28 + $0x1f0] sm:$0xff] }
 0x193   : > { %v2001_v38 = vadd.f32 %v402_v8, %v398_v18  ;;  %v2007_v44 = vadd.f32 %v403_v13, %v399_v26  ;;  %v2011_v46 = vadd.f32 %v405_v15, %v401_v28  ;;  %v2024_v55 = vmul.f32 %v1522_v17, %v525_v10  ;;  %v1607_v8 = vld [vmem:[%s1925_s28 + $0x4e8] sm:$0xff]  ;;  %v1609_v17 = vld [vmem:[%s1925_s28 + $0x4f8] sm:$0xff] }
 0x194   : > { %v2013_v47 = vadd.f32 %v414_v16, %v410_v29  ;;  %v2018_v51 = vadd.f32 %v415_v19, %v411_v35  ;;  %v2020_v52 = vadd.f32 %v416_v20, %v412_v36  ;;  %v2022_v53 = vadd.f32 %v417_v21, %v413_v37  ;;  %v1608_v16 = vld [vmem:[%s1925_s28 + $0x4f0] sm:$0xff]  ;;  %v1530_v19 = vld [vmem:[%s1925_s28 + $0x100] sm:$0x3f]  ;;  %v1545_v37 = vld [vmem:[%s1925_s28 + $0x418] sm:$0x3f] }
 0x195   : > { %v2029_v59 = vmul.f32 %v1523_v22, %v525_v10  ;;  %v2031_v0 = vmul.f32 %v1524_v23, %v525_v10  ;;  %v2033_v1 = vmul.f32 %v1525_v24, %v525_v10  ;;  %v2035_v5 = vmul.f32 %v1534_v25, %v525_v10  ;;  %v1531_v24 = vld [vmem:[%s1925_s28 + $0x108] sm:$0x3f]  ;;  %v1532_v25 = vld [vmem:[%s1925_s28 + $0x110] sm:$0x3f] }
 0x196   : > { %1230 = vperm.xlu2 %1737, %v1940_v48   ;;  %v2041_v11 = vmul.f32 %v1535_v30, %v525_v10  ;;  %v2043_v12 = vmul.f32 %v1536_v32, %v525_v10  ;;  %v2045_v13 = vmul.f32 %v1537_v33, %v525_v10  ;;  %v258_v20 = vmul.f32 %v244_v39, %v215_v40  ;;  %v1533_v10 = vld [vmem:[%s1925_s28 + $0x118] sm:$0x3f]  ;;  %v1542_v30 = vld [vmem:[%s1925_s28 + $0x400] sm:$0x3f]  ;;  %v1543_v32 = vld [vmem:[%s1925_s28 + $0x408] sm:$0x3f] }
 0x197   : > { %1084 = vperm.xlu1 %1736, %v1907_v27   ;;  %v400_v27 = vmul.f32 %v1500_v56, %v1927_v31  ;;  %v227_v31 = vld [vmem:[%s1925_s28 + $0x308] sm:$0xff]  ;;  %v1594_v56 = vld [vmem:[%s1925_s28 + $0x1e0] sm:$0xff]  ;;  %2929 = vst [vmem:[#allocation5_spill] sm:$0xff] %v2035_v5  ;;  %v259_v21 = vmul.f32 %v244_v39, %v216_v41  ;;  %v260_v22 = vmul.f32 %v244_v39, %v217_v42  ;;  %v1544_v33 = vld [vmem:[%s1925_s28 + $0x410] sm:$0x3f] }
 0x198   : > { %2930 = vst [vmem:[#allocation6_spill] sm:$0xff] %v2041_v11  ;;  %v269_v23 = vmul.f32 %v244_v39, %v226_v43  ;;  %v270_v26 = vmul.f32 %v244_v39, %v227_v31  ;;  %v272_v28 = vmul.f32 %v244_v39, %v229_v50  ;;  %v218_v41 = vld [vmem:[%s1925_s28 + $0x20] sm:$0xff] }
 0x199   : > { %v2009_v45 = vadd.f32 %v404_v14, %v400_v27  ;;  %2931 = vst [vmem:[#allocation7_spill] sm:$0xff] %v2043_v12  ;;  %v257_v14 = vmul.f32 %v244_v39, %v214_v34  ;;  %v271_v27 = vmul.f32 %v244_v39, %v228_v49  ;;  %v219_v39 = vld [vmem:[%s1925_s28 + $0x28] sm:$0xff] }
 0x19a   : > { %2932 = vst [vmem:[#allocation8_spill] sm:$0xff] %v2045_v13 }
 0x19f   : > { %1224 = vperm.xlu1 %1736, %v1940_v48  }
 0x1a0   : > { %v945_v15 = vpop.permute.xlu0 %944  ;;  %v537_v18 = vpop.permute.xlu2 %536 }
 0x1a1   : > { %v2053_v29 = vmul.f32 %v1594_v56, %v945_v15  ;;  %v2058_v34 = vmul.f32 %v1595_v57, %v945_v15  ;;  %v2060_v35 = vmul.f32 %v1596_v58, %v945_v15  ;;  %v2062_v36 = vmul.f32 %v1597_v6, %v945_v15  ;;  %v250_v50 = vpop.permute.xlu1 %249  ;;  %v220_v56 = vld [vmem:[%s1925_s28 + $0x30] sm:$0xff]  ;;  %v221_v57 = vld [vmem:[%s1925_s28 + $0x38] sm:$0xff]  ;;  %v230_v58 = vld [vmem:[%s1925_s28 + $0x320] sm:$0xff] }
 0x1a2   : > { %v546_v40 = vmul.f32 %v1530_v19, %v537_v18  ;;  %v2067_v42 = vmul.f32 %v1606_v7, %v945_v15  ;;  %v2069_v43 = vmul.f32 %v1607_v8, %v945_v15  ;;  %v2071_v31 = vmul.f32 %v1608_v16, %v945_v15  ;;  %v231_v7 = vld [vmem:[%s1925_s28 + $0x328] sm:$0xff]  ;;  %v233_v8 = vld [vmem:[%s1925_s28 + $0x338] sm:$0xff] }
 0x1a3   : > { %2933 = vst [vmem:[#allocation9_spill] sm:$0xff] %v2053_v29  ;;  %v2073_v49 = vmul.f32 %v1609_v17, %v945_v15  ;;  %v2078_v6 = vmul.f32 %v1531_v24, %v537_v18  ;;  %v2082_v19 = vmul.f32 %v1533_v10, %v537_v18  ;;  %v2091_v16 = vmul.f32 %v1544_v33, %v537_v18 }
 0x1a4   : > { %2934 = vst [vmem:[#allocation10_spill] sm:$0xff] %v2058_v34  ;;  %v2093_v15 = vmul.f32 %v1545_v37, %v537_v18  ;;  %v2096_v17 = vsel %vm282_vm5, %v546_v40, 0.0  ;;  %v261_v24 = vmul.f32 %v250_v50, %v218_v41  ;;  %v273_v10 = vmul.f32 %v250_v50, %v230_v58 }
 0x1a5   : > { %2935 = vst [vmem:[#allocation11_spill] sm:$0xff] %v2060_v35  ;;  %v2084_v35 = vmul.f32 %v1542_v30, %v537_v18  ;;  %v274_v30 = vmul.f32 %v250_v50, %v231_v7  ;;  %v276_v29 = vmul.f32 %v250_v50, %v233_v8 }
 0x1a6   : > { %2936 = vst [vmem:[#allocation12_spill] sm:$0xff] %v2062_v36  ;;  %v2080_v36 = vmul.f32 %v1532_v25, %v537_v18  ;;  %v263_v25 = vmul.f32 %v250_v50, %v220_v56  ;;  %v281_v13 = vadd.f32 %v261_v24, %v257_v14  ;;  %v318_v11 = vadd.f32 %v273_v10, %v269_v23 }
 0x1a7   : > { %2937 = vst [vmem:[#allocation13_spill] sm:$0xff] %v2067_v42  ;;  %v232_v42 = vld [vmem:[%s1925_s28 + $0x330] sm:$0xff]  ;;  %1739 = vset.pattern.permute.xlu1 %v1892_v9  ;;  %v345_v5 = vadd.f32 %v276_v29, %v272_v28 }
 0x1a8   : > { %2938 = vst [vmem:[#allocation14_spill] sm:$0xff] %v2069_v43  ;;  %v2089_v43 = vmul.f32 %v1543_v32, %v537_v18  ;;  %v275_v34 = vmul.f32 %v250_v50, %v232_v42  ;;  %v300_v12 = vadd.f32 %v263_v25, %v259_v21  ;;  %v327_v18 = vadd.f32 %v274_v30, %v270_v26 }
 0x1a9   : > { %2939 = vst [vmem:[#allocation15_spill] sm:$0xff] %v2071_v31  ;;  %v264_v31 = vmul.f32 %v250_v50, %v221_v57  ;;  %v284_v40 = vadd.f32 %v1947_v54, %v281_v13  ;;  %v320_v56 = vadd.f32 %v1965_v63, %v318_v11 }
 0x1aa   : > { %2940 = vst [vmem:[#allocation16_spill] sm:$0xff] %v2073_v49  ;;  %v262_v49 = vmul.f32 %v250_v50, %v219_v39  ;;  %v336_v37 = vadd.f32 %v275_v34, %v271_v27  ;;  %v302_v39 = vadd.f32 %v1959_v61, %v300_v12  ;;  %v329_v42 = vadd.f32 %v1971_v2, %v327_v18  ;;  %v1628_v18 = vld [vmem:[%s1925_s28 + $0x290] sm:$0x3f] }
 0x1ab   : > { %v309_v33 = vadd.f32 %v264_v31, %v260_v22  ;;  %v285_v21 = vrot.slane %v284_v40, 4  ;;  %v321_v27 = vrot.slane %v320_v56, 4 }
 0x1ac   : > { %v291_v32 = vadd.f32 %v262_v49, %v258_v20  ;;  %v338_v14 = vadd.f32 %v1974_v3, %v336_v37  ;;  %v347_v20 = vadd.f32 %v1977_v4, %v345_v5  ;;  %v303_v23 = vrot.slane %v302_v39, 4  ;;  %v1629_v37 = vld [vmem:[%s1925_s28 + $0x298] sm:$0x3f] }
 0x1ad   : > { %v311_v9 = vadd.f32 %v1962_v62, %v309_v33  ;;  %v330_v54 = vrot.slane %v329_v42, 4  ;;  %v286_v28 = vadd.f32 %v285_v21, %v284_v40  ;;  %v322_v63 = vadd.f32 %v321_v27, %v320_v56  ;;  %v1627_v33 = vld [vmem:[%s1925_s28 + $0x288] sm:$0x3f]  ;;  %v1638_v56 = vld [vmem:[%s1925_s28 + $0x580] sm:$0x3f] }
 0x1ae   : > { %v293_v41 = vadd.f32 %v1956_v60, %v291_v32  ;;  %v339_v13 = vrot.slane %v338_v14, 4  ;;  %v348_v60 = vrot.slane %v347_v20, 4  ;;  %v304_v12 = vadd.f32 %v303_v23, %v302_v39  ;;  %v1626_v32 = vld [vmem:[%s1925_s28 + $0x280] sm:$0x3f]  ;;  %v1640_v21 = vld [vmem:[%s1925_s28 + $0x590] sm:$0x3f] }
 0x1af   : > { %v312_v26 = vrot.slane %v311_v9, 4  ;;  %1236 = vperm.xlu1 %1739, %v1940_v48   ;;  %v331_v2 = vadd.f32 %v330_v54, %v329_v42  ;;  %v287_v29 = vrot.slane %v286_v28, 2  ;;  %v323_v31 = vrot.slane %v322_v63, 2  ;;  %v1639_v42 = vld [vmem:[%s1925_s28 + $0x588] sm:$0x3f] }
 0x1b0   : > { %v294_v22 = vrot.slane %v293_v41, 4  ;;  %v340_v11 = vadd.f32 %v339_v13, %v338_v14  ;;  %v349_v3 = vadd.f32 %v348_v60, %v347_v20  ;;  %v305_v5 = vrot.slane %v304_v12, 2  ;;  %v1641_v27 = vld [vmem:[%s1925_s28 + $0x598] sm:$0x3f] }
 0x1b1   : > { %v313_v62 = vadd.f32 %v312_v26, %v311_v9  ;;  %v332_v49 = vrot.slane %v331_v2, 2  ;;  %v288_v58 = vadd.f32 %v287_v29, %v286_v28  ;;  %v324_v24 = vadd.f32 %v323_v31, %v322_v63  ;;  %v1507_v29 = vld [vmem:[%s1925_s28 + $0xa8] sm:$0x3f] }
 0x1b2   : > { %v295_v61 = vadd.f32 %v294_v22, %v293_v41  ;;  %v341_v50 = vrot.slane %v340_v11, 2  ;;  %v350_v57 = vrot.slane %v349_v3, 2  ;;  %v306_v48 = vadd.f32 %v305_v5, %v304_v12 }
 0x1b3   : > { %v314_v34 = vrot.slane %v313_v62, 2  ;;  %v333_v25 = vadd.f32 %v332_v49, %v331_v2  ;;  %v2114_v40 = vsel %vm282_vm5, %v2078_v6, 0.0  ;;  %v2118_v41 = vsel %vm282_vm5, %v2080_v36, 0.0  ;;  %v2157_v49 = vpop.permute.xlu2 %670 }
 0x1b4   : > { %v296_v4 = vrot.slane %v295_v61, 2  ;;  %v342_v10 = vadd.f32 %v341_v50, %v340_v11  ;;  %v351_v30 = vadd.f32 %v350_v57, %v349_v3  ;;  %v2122_v39 = vsel %vm282_vm5, %v2082_v19, 0.0  ;;  %v1097_v19 = vpop.permute.xlu0 %1096  ;;  %v1550_v11 = vld [vmem:[%s1925_s28 + $0x140] sm:$0xff]  ;;  %v1508_v50 = vld [vmem:[%s1925_s28 + $0xb0] sm:$0x3f] }
 0x1b5   : > { %v315_v8 = vadd.f32 %v314_v34, %v313_v62  ;;  %v289_v9 = vrot.slane %v288_v58, 1  ;;  %v2128_v14 = vsel %vm282_vm5, %v2084_v35, 0.0  ;;  %v2132_v6 = vsel %vm282_vm5, %v2089_v43, 0.0  ;;  %v1506_v3 = vld [vmem:[%s1925_s28 + $0xa0] sm:$0x3f] }
 0x1b6   : > { %v297_v7 = vadd.f32 %v296_v4, %v295_v61  ;;  %v2136_v20 = vsel %vm282_vm5, %v2091_v16, 0.0  ;;  %v2140_v36 = vsel %vm282_vm5, %v2093_v15, 0.0  ;;  %v307_v23 = vrot.slane %v306_v48, 1  ;;  %v1509_v57 = vld [vmem:[%s1925_s28 + $0xb8] sm:$0x3f] }
 0x1b7   : > { %v316_v26 = vrot.slane %v315_v8, 1  ;;  %v325_v35 = vrot.slane %v324_v24, 1  ;;  %v2144_v43 = vadd.f32 %v289_v9, %v288_v58  ;;  %v334_v54 = vrot.slane %v333_v25, 1  ;;  %v1518_v58 = vld [vmem:[%s1925_s28 + $0x3a0] sm:$0x3f] }
 0x1b8   : > { %v298_v22 = vrot.slane %v297_v7, 1  ;;  %v343_v13 = vrot.slane %v342_v10, 1  ;;  %v352_v16 = vrot.slane %v351_v30, 1  ;;  %v1106_v60 = vmul.f32 %v1626_v32, %v1097_v19 }
 0x1b9   : > { %v1107_v28 = vmul.f32 %v1627_v33, %v1097_v19  ;;  %v1108_v15 = vmul.f32 %v1628_v18, %v1097_v19  ;;  %v1109_v61 = vmul.f32 %v1629_v37, %v1097_v19  ;;  %v1118_v12 = vmul.f32 %v1638_v56, %v1097_v19  ;;  %v1520_v37 = vld [vmem:[%s1925_s28 + $0x3b0] sm:$0x3f] }
 0x1ba   : > { %v1119_v62 = vmul.f32 %v1639_v42, %v1097_v19  ;;  %v1120_v63 = vmul.f32 %v1640_v21, %v1097_v19  ;;  %v1121_v2 = vmul.f32 %v1641_v27, %v1097_v19  ;;  %v2149_v4 = vadd.f32 %v298_v22, %v297_v7 }
 0x1bb   : > { %v2151_v5 = vadd.f32 %v307_v23, %v306_v48  ;;  %v2153_v34 = vadd.f32 %v316_v26, %v315_v8  ;;  %v2155_v31 = vadd.f32 %v325_v35, %v324_v24  ;;  %v2162_v32 = vadd.f32 %v334_v54, %v333_v25  ;;  %v397_v48 = vpop.permute.xlu1 %396  ;;  %v1519_v8 = vld [vmem:[%s1925_s28 + $0x3a8] sm:$0x3f] }
 0x1bc   : > { %v2164_v33 = vadd.f32 %v343_v13, %v342_v10  ;;  %v2166_v18 = vadd.f32 %v352_v16, %v351_v30  ;;  %v2169_v7 = vsel %vm282_vm5, %v1106_v60, 0.0  ;;  %v2174_v24 = vsel %vm282_vm5, %v1107_v28, 0.0  ;;  %v1521_v10 = vld [vmem:[%s1925_s28 + $0x3b8] sm:$0x3f] }
 0x1bd   : > { %2941 = vst [vmem:[#allocation17_spill] sm:$0xff] %v2169_v7  ;;  %v2177_v9 = vsel %vm282_vm5, %v1108_v15, 0.0  ;;  %v2180_v56 = vsel %vm282_vm5, %v1109_v61, 0.0  ;;  %v2183_v25 = vsel %vm282_vm5, %v1118_v12, 0.0  ;;  %v2187_v30 = vsel %vm282_vm5, %v1119_v62, 0.0 }
 0x1be   : > { %2942 = vst [vmem:[#allocation18_spill] sm:$0xff] %v2174_v24  ;;  %v2190_v42 = vsel %vm282_vm5, %v1120_v63, 0.0  ;;  %v2193_v19 = vsel %vm282_vm5, %v1121_v2, 0.0  ;;  %v2196_v21 = vmul.f32 %v1550_v11, %v2157_v49  ;;  %v406_v22 = vmul.f32 %v1506_v3, %v397_v48 }
 0x1bf   : > { %2943 = vst [vmem:[#allocation19_spill] sm:$0xff] %v2177_v9  ;;  %v407_v23 = vmul.f32 %v1507_v29, %v397_v48  ;;  %v408_v26 = vmul.f32 %v1508_v50, %v397_v48  ;;  %v409_v35 = vmul.f32 %v1509_v57, %v397_v48  ;;  %v418_v27 = vmul.f32 %v1518_v58, %v397_v48 }
 0x1c0   : > { %2944 = vst [vmem:[#allocation20_spill] sm:$0xff] %v2180_v56  ;;  %v419_v54 = vmul.f32 %v1519_v8, %v397_v48  ;;  %v420_v13 = vmul.f32 %v1520_v37, %v397_v48  ;;  %v421_v16 = vmul.f32 %v1521_v10, %v397_v48  ;;  %v423_v60 = vsel %vm282_vm5, %v406_v22, 0.0 }
 0x1c1   : > { %2945 = vst [vmem:[#allocation21_spill] sm:$0xff] %v2183_v25  ;;  %v432_v28 = vsel %vm282_vm5, %v407_v23, 0.0  ;;  %v441_v15 = vsel %vm282_vm5, %v408_v26, 0.0  ;;  %v450_v61 = vsel %vm282_vm5, %v409_v35, 0.0  ;;  %v424_v12 = vadd.f32 %v423_v60, %v2001_v38 }
 0x1c2   : > { %2946 = vst [vmem:[#allocation22_spill] sm:$0xff] %v2187_v30  ;;  %v433_v62 = vadd.f32 %v432_v28, %v2007_v44  ;;  %v442_v63 = vadd.f32 %v441_v15, %v2009_v45  ;;  %v451_v2 = vadd.f32 %v450_v61, %v2011_v46  ;;  %v459_v11 = vsel %vm282_vm5, %v418_v27, 0.0 }
 0x1c3   : > { %2947 = vst [vmem:[#allocation23_spill] sm:$0xff] %v2190_v42  ;;  %v468_v3 = vsel %vm282_vm5, %v419_v54, 0.0  ;;  %v477_v29 = vsel %vm282_vm5, %v420_v13, 0.0  ;;  %v486_v50 = vsel %vm282_vm5, %v421_v16, 0.0  ;;  %v425_v57 = vrot.slane %v424_v12, 4  ;;  %v2949_v42 = vld [vmem:[#allocation5_spill] sm:$0xff] }
 0x1c4   : > { %2948 = vst [vmem:[#allocation24_spill] sm:$0xff] %v2193_v19  ;;  %v434_v58 = vrot.slane %v433_v62, 4  ;;  %v443_v48 = vrot.slane %v442_v63, 4  ;;  %v452_v8 = vrot.slane %v451_v2, 4  ;;  %v460_v38 = vadd.f32 %v459_v11, %v2013_v47 }
 0x1c5   : > { %v469_v44 = vadd.f32 %v468_v3, %v2018_v51  ;;  %v478_v45 = vadd.f32 %v477_v29, %v2020_v52  ;;  %v487_v46 = vadd.f32 %v486_v50, %v2022_v53  ;;  %v426_v37 = vadd.f32 %v425_v57, %v424_v12 }
 0x1c6   : > { %v435_v10 = vadd.f32 %v434_v58, %v433_v62  ;;  %v444_v22 = vadd.f32 %v443_v48, %v442_v63  ;;  %v453_v23 = vadd.f32 %v452_v8, %v451_v2  ;;  %v461_v26 = vrot.slane %v460_v38, 4  ;;  %v1551_v63 = vld [vmem:[%s1925_s28 + $0x148] sm:$0xff]  ;;  %v1552_v8 = vld [vmem:[%s1925_s28 + $0x150] sm:$0xff] }
 0x1c7   : > { %v470_v35 = vrot.slane %v469_v44, 4  ;;  %v479_v27 = vrot.slane %v478_v45, 4  ;;  %v488_v54 = vrot.slane %v487_v46, 4  ;;  %v427_v13 = vrot.slane %v426_v37, 2 }
 0x1c8   : > { %v436_v16 = vrot.slane %v435_v10, 2  ;;  %v445_v60 = vrot.slane %v444_v22, 2  ;;  %v454_v47 = vrot.slane %v453_v23, 2  ;;  %v462_v28 = vadd.f32 %v461_v26, %v460_v38  ;;  %v1553_v38 = vld [vmem:[%s1925_s28 + $0x158] sm:$0xff] }
 0x1c9   : > { %v471_v51 = vadd.f32 %v470_v35, %v469_v44  ;;  %v480_v52 = vadd.f32 %v479_v27, %v478_v45  ;;  %v489_v53 = vadd.f32 %v488_v54, %v487_v46  ;;  %v428_v15 = vadd.f32 %v427_v13, %v426_v37  ;;  %v1562_v44 = vld [vmem:[%s1925_s28 + $0x440] sm:$0xff]  ;;  %v1565_v13 = vld [vmem:[%s1925_s28 + $0x458] sm:$0xff] }
 0x1ca   : > { %v437_v61 = vadd.f32 %v436_v16, %v435_v10  ;;  %v446_v12 = vadd.f32 %v445_v60, %v444_v22  ;;  %v455_v62 = vadd.f32 %v454_v47, %v453_v23  ;;  %v463_v2 = vrot.slane %v462_v28, 2  ;;  %v1563_v22 = vld [vmem:[%s1925_s28 + $0x448] sm:$0xff]  ;;  %v1564_v23 = vld [vmem:[%s1925_s28 + $0x450] sm:$0xff] }
 0x1cb   : > { %v472_v11 = vrot.slane %v471_v51, 2  ;;  %v481_v3 = vrot.slane %v480_v52, 2  ;;  %v490_v29 = vrot.slane %v489_v53, 2  ;;  %v429_v50 = vrot.slane %v428_v15, 1 }
 0x1cc   : > { %v438_v57 = vrot.slane %v437_v61, 1  ;;  %v447_v58 = vrot.slane %v446_v12, 1  ;;  %v456_v48 = vrot.slane %v455_v62, 1  ;;  %v464_v45 = vadd.f32 %v463_v2, %v462_v28 }
 0x1cd   : > { %v473_v46 = vadd.f32 %v472_v11, %v471_v51  ;;  %v482_v37 = vadd.f32 %v481_v3, %v480_v52  ;;  %v491_v10 = vadd.f32 %v490_v29, %v489_v53  ;;  %v2221_v26 = vmul.f32 %v1551_v63, %v2157_v49  ;;  %v2241_v3 = vpop.permute.xlu2 %804  ;;  %v1572_v29 = vld [vmem:[%s1925_s28 + $0x190] sm:$0xff] }
 0x1ce   : > { %v430_v35 = vadd.f32 %v429_v50, %v428_v15  ;;  %v439_v27 = vadd.f32 %v438_v57, %v437_v61  ;;  %v448_v54 = vadd.f32 %v447_v58, %v446_v12  ;;  %v457_v16 = vadd.f32 %v456_v48, %v455_v62  ;;  %v1570_v61 = vld [vmem:[%s1925_s28 + $0x180] sm:$0xff]  ;;  %v1571_v12 = vld [vmem:[%s1925_s28 + $0x188] sm:$0xff]  ;;  %v1573_v50 = vld [vmem:[%s1925_s28 + $0x198] sm:$0xff] }
 0x1cf   : > { %v465_v60 = vrot.slane %v464_v45, 1  ;;  %v483_v47 = vrot.slane %v482_v37, 1  ;;  %v492_v28 = vrot.slane %v491_v10, 1  ;;  %v2225_v51 = vmul.f32 %v1552_v8, %v2157_v49  ;;  %v1526_v57 = vld [vmem:[%s1925_s28 + $0xe0] sm:$0xff] }
 0x1d0   : > { %v2228_v52 = vmul.f32 %v1553_v38, %v2157_v49  ;;  %v2231_v53 = vmul.f32 %v1562_v44, %v2157_v49  ;;  %v474_v15 = vrot.slane %v473_v46, 1  ;;  %v2236_v62 = vmul.f32 %v1563_v22, %v2157_v49  ;;  %v531_v44 = vpop.permute.xlu1 %530  ;;  %v1529_v22 = vld [vmem:[%s1925_s28 + $0xf8] sm:$0xff] }
 0x1d1   : > { %v2239_v63 = vmul.f32 %v1564_v23, %v2157_v49  ;;  %v484_v2 = vadd.f32 %v483_v47, %v482_v37  ;;  %v493_v11 = vadd.f32 %v492_v28, %v491_v10  ;;  %v2247_v58 = vmul.f32 %v1565_v13, %v2157_v49  ;;  %v1527_v37 = vld [vmem:[%s1925_s28 + $0xe8] sm:$0xff]  ;;  %v1528_v10 = vld [vmem:[%s1925_s28 + $0xf0] sm:$0xff] }
 0x1d2   : > { %v2251_v48 = vsel %vm1334_vm6, %v2144_v43, %v430_v35  ;;  %v2255_v8 = vsel %vm1334_vm6, %v2149_v4, %v439_v27  ;;  %v2259_v38 = vsel %vm1334_vm6, %v2151_v5, %v448_v54  ;;  %v2264_v23 = vadd.f32 %v465_v60, %v464_v45  ;;  %v1538_v5 = vld [vmem:[%s1925_s28 + $0x3e0] sm:$0xff]  ;;  %v1539_v35 = vld [vmem:[%s1925_s28 + $0x3e8] sm:$0xff]  ;;  %v1540_v27 = vld [vmem:[%s1925_s28 + $0x3f0] sm:$0xff] }
 0x1d3   : > { %v2268_v49 = vsel %vm1334_vm6, %v2153_v34, %v457_v16  ;;  %v2272_v43 = vsel %vm1334_vm6, %v2164_v33, %v484_v2  ;;  %v2276_v4 = vsel %vm1334_vm6, %v2166_v18, %v493_v11  ;;  %v2281_v54 = vadd.f32 %v474_v15, %v473_v46  ;;  %v1541_v33 = vld [vmem:[%s1925_s28 + $0x3f8] sm:$0xff] }
 0x1d4   : > { %v2284_v45 = vmul.f32 %v1570_v61, %v2241_v3  ;;  %v2287_v13 = vmul.f32 %v1571_v12, %v2241_v3  ;;  %v2290_v34 = vmul.f32 %v1572_v29, %v2241_v3  ;;  %v2294_v16 = vmul.f32 %v1573_v50, %v2241_v3  ;;  %v2950_v50 = vld [vmem:[#allocation6_spill] sm:$0xff] }
 0x1d5   : > { %v542_v18 = vmul.f32 %v1526_v57, %v531_v44  ;;  %v543_v60 = vmul.f32 %v1527_v37, %v531_v44  ;;  %v544_v47 = vmul.f32 %v1528_v10, %v531_v44  ;;  %v545_v28 = vmul.f32 %v1529_v22, %v531_v44  ;;  %v2951_v57 = vld [vmem:[#allocation7_spill] sm:$0xff] }
 0x1d6   : > { %v554_v2 = vmul.f32 %v1538_v5, %v531_v44  ;;  %v555_v46 = vmul.f32 %v1539_v35, %v531_v44  ;;  %v556_v15 = vmul.f32 %v1540_v27, %v531_v44  ;;  %v557_v11 = vmul.f32 %v1541_v33, %v531_v44  ;;  %v2952_v5 = vld [vmem:[#allocation8_spill] sm:$0xff] }
 0x1d7   : > { %v562_v61 = vadd.f32 %v542_v18, %v2024_v55  ;;  %v571_v12 = vadd.f32 %v543_v60, %v2029_v59  ;;  %v580_v19 = vadd.f32 %v544_v47, %v2031_v0  ;;  %v589_v29 = vadd.f32 %v545_v28, %v2033_v1 }
 0x1d8   : > { %v598_v30 = vadd.f32 %v554_v2, %v2949_v42  ;;  %v607_v25 = vadd.f32 %v555_v46, %v2950_v50  ;;  %v616_v37 = vadd.f32 %v556_v15, %v2951_v57  ;;  %v625_v55 = vadd.f32 %v557_v11, %v2952_v5 }
 0x1d9   : > { %v564_v10 = vadd.f32 %v2096_v17, %v562_v61  ;;  %v573_v22 = vadd.f32 %v2114_v40, %v571_v12  ;;  %v582_v44 = vadd.f32 %v2118_v41, %v580_v19  ;;  %v591_v59 = vadd.f32 %v2122_v39, %v589_v29 }
 0x1da   : > { %v600_v0 = vadd.f32 %v2128_v14, %v598_v30  ;;  %v609_v1 = vadd.f32 %v2132_v6, %v607_v25  ;;  %v618_v42 = vadd.f32 %v2136_v20, %v616_v37  ;;  %v627_v18 = vadd.f32 %v2140_v36, %v625_v55 }
 0x1db   : > { %v565_v35 = vrot.slane %v564_v10, 4  ;;  %v574_v27 = vrot.slane %v573_v22, 4  ;;  %v583_v33 = vrot.slane %v582_v44, 4  ;;  %v592_v17 = vrot.slane %v591_v59, 4 }
 0x1dc   : > { %v601_v60 = vrot.slane %v600_v0, 4  ;;  %v610_v40 = vrot.slane %v609_v1, 4  ;;  %v619_v47 = vrot.slane %v618_v42, 4  ;;  %v628_v2 = vrot.slane %v627_v18, 4 }
 0x1dd   : > { %v566_v41 = vadd.f32 %v565_v35, %v564_v10  ;;  %v575_v19 = vadd.f32 %v574_v27, %v573_v22  ;;  %v584_v28 = vadd.f32 %v583_v33, %v582_v44  ;;  %v593_v39 = vadd.f32 %v592_v17, %v591_v59  ;;  %v817_v17 = vpop.permute.xlu2 %816 }
 0x1de   : > { %v602_v46 = vadd.f32 %v601_v60, %v600_v0  ;;  %v611_v14 = vadd.f32 %v610_v40, %v609_v1  ;;  %v620_v30 = vadd.f32 %v619_v47, %v618_v42  ;;  %v629_v15 = vadd.f32 %v628_v2, %v627_v18  ;;  %v1582_v42 = vld [vmem:[%s1925_s28 + $0x480] sm:$0xff]  ;;  %v1583_v60 = vld [vmem:[%s1925_s28 + $0x488] sm:$0xff]  ;;  %v1584_v40 = vld [vmem:[%s1925_s28 + $0x490] sm:$0xff] }
 0x1df   : > { %v567_v6 = vrot.slane %v566_v41, 2  ;;  %v576_v25 = vrot.slane %v575_v19, 2  ;;  %v585_v20 = vrot.slane %v584_v28, 2  ;;  %v594_v11 = vrot.slane %v593_v39, 2  ;;  %v1585_v47 = vld [vmem:[%s1925_s28 + $0x498] sm:$0xff] }
 0x1e0   : > { %v603_v61 = vrot.slane %v602_v46, 2  ;;  %v612_v36 = vrot.slane %v611_v14, 2  ;;  %v621_v12 = vrot.slane %v620_v30, 2  ;;  %v630_v37 = vrot.slane %v629_v15, 2 }
 0x1e1   : > { %v568_v29 = vadd.f32 %v567_v6, %v566_v41  ;;  %v577_v50 = vadd.f32 %v576_v25, %v575_v19  ;;  %v586_v57 = vadd.f32 %v585_v20, %v584_v28  ;;  %v595_v10 = vadd.f32 %v594_v11, %v593_v39  ;;  %v1579_v6 = vld [vmem:[%s1925_s28 + $0x1c8] sm:$0x3f] }
 0x1e2   : > { %v604_v22 = vadd.f32 %v603_v61, %v602_v46  ;;  %v613_v44 = vadd.f32 %v612_v36, %v611_v14  ;;  %v622_v5 = vadd.f32 %v621_v12, %v620_v30  ;;  %v631_v1 = vadd.f32 %v630_v37, %v629_v15  ;;  %v1578_v30 = vld [vmem:[%s1925_s28 + $0x1c0] sm:$0x3f]  ;;  %v1592_v37 = vld [vmem:[%s1925_s28 + $0x4d0] sm:$0x3f] }
 0x1e3   : > { %v569_v55 = vrot.slane %v568_v29, 1  ;;  %v578_v59 = vrot.slane %v577_v50, 1  ;;  %v587_v0 = vrot.slane %v586_v57, 1  ;;  %v596_v35 = vrot.slane %v595_v10, 1 }
 0x1e4   : > { %v605_v27 = vrot.slane %v604_v22, 1  ;;  %v614_v33 = vrot.slane %v613_v44, 1  ;;  %v623_v18 = vrot.slane %v622_v5, 1  ;;  %v632_v28 = vrot.slane %v631_v1, 1 }
 0x1e5   : > { %v570_v41 = vadd.f32 %v569_v55, %v568_v29  ;;  %v579_v19 = vadd.f32 %v578_v59, %v577_v50  ;;  %v588_v2 = vadd.f32 %v587_v0, %v586_v57  ;;  %v597_v39 = vadd.f32 %v596_v35, %v595_v10  ;;  %v1591_v57 = vld [vmem:[%s1925_s28 + $0x4c8] sm:$0x3f]  ;;  %v1593_v10 = vld [vmem:[%s1925_s28 + $0x4d8] sm:$0x3f]  ;;  %v665_v55 = vpop.permute.xlu1 %664  ;;  %v1546_v59 = vld [vmem:[%s1925_s28 + $0x120] sm:$0xff] }
 0x1e6   : > { %v606_v46 = vadd.f32 %v605_v27, %v604_v22  ;;  %v615_v14 = vadd.f32 %v614_v33, %v613_v44  ;;  %v1339_v25 = vsel %vm1334_vm6, %v2155_v31, %v2264_v23  ;;  %v1340_v20 = vsel %vm1334_vm6, %v2162_v32, %v2281_v54  ;;  %v1580_v31 = vld [vmem:[%s1925_s28 + $0x1d0] sm:$0x3f]  ;;  %v1581_v23 = vld [vmem:[%s1925_s28 + $0x1d8] sm:$0x3f]  ;;  %v1590_v32 = vld [vmem:[%s1925_s28 + $0x4c0] sm:$0x3f] }
 0x1e7   : > { %v624_v15 = vadd.f32 %v623_v18, %v622_v5  ;;  %v633_v11 = vadd.f32 %v632_v28, %v631_v1  ;;  %v2326_v61 = vmul.f32 %v1582_v42, %v2241_v3  ;;  %v2329_v36 = vmul.f32 %v1583_v60, %v2241_v3  ;;  %v1547_v0 = vld [vmem:[%s1925_s28 + $0x128] sm:$0xff]  ;;  %v1548_v1 = vld [vmem:[%s1925_s28 + $0x130] sm:$0xff]  ;;  %v1549_v27 = vld [vmem:[%s1925_s28 + $0x138] sm:$0xff] }
 0x1e8   : > { %v2332_v12 = vmul.f32 %v1584_v40, %v2241_v3  ;;  %v2335_v29 = vmul.f32 %v1585_v47, %v2241_v3  ;;  %v2342_v54 = vsel %vm1343_vm7, %v2251_v48, %v570_v41  ;;  %v2346_v50 = vsel %vm1343_vm7, %v2255_v8, %v579_v19  ;;  %v1558_v33 = vld [vmem:[%s1925_s28 + $0x420] sm:$0xff]  ;;  %v1559_v18 = vld [vmem:[%s1925_s28 + $0x428] sm:$0xff]  ;;  %v1560_v19 = vld [vmem:[%s1925_s28 + $0x430] sm:$0xff] }
 0x1e9   : > { %v826_v3 = vmul.f32 %v1578_v30, %v817_v17  ;;  %v827_v22 = vmul.f32 %v1579_v6, %v817_v17  ;;  %v2353_v44 = vsel %vm1343_vm7, %v2259_v38, %v588_v2  ;;  %v2357_v48 = vsel %vm1343_vm7, %v2268_v49, %v597_v39  ;;  %v1561_v28 = vld [vmem:[%s1925_s28 + $0x438] sm:$0xff] }
 0x1ea   : > { %v2360_v5 = vsel %vm1343_vm7, %v1339_v25, %v606_v46  ;;  %v2363_v8 = vsel %vm1343_vm7, %v1340_v20, %v615_v14  ;;  %v2370_v38 = vsel %vm1343_vm7, %v2272_v43, %v624_v15  ;;  %v2374_v49 = vsel %vm1343_vm7, %v2276_v4, %v633_v11  ;;  %v957_v25 = vpop.permute.xlu2 %956  ;;  %v1603_v20 = vld [vmem:[%s1925_s28 + $0x228] sm:$0x3f] }
 0x1eb   : > { %v828_v42 = vmul.f32 %v1580_v31, %v817_v17  ;;  %v829_v35 = vmul.f32 %v1581_v23, %v817_v17  ;;  %v838_v60 = vmul.f32 %v1590_v32, %v817_v17  ;;  %v839_v40 = vmul.f32 %v1591_v57, %v817_v17  ;;  %v1604_v32 = vld [vmem:[%s1925_s28 + $0x230] sm:$0x3f]  ;;  %v1605_v57 = vld [vmem:[%s1925_s28 + $0x238] sm:$0x3f] }
 0x1ec   : > { %v840_v47 = vmul.f32 %v1592_v37, %v817_v17  ;;  %v841_v41 = vmul.f32 %v1593_v10, %v817_v17  ;;  %v2382_v43 = vsel %vm282_vm5, %v826_v3, 0.0  ;;  %v2385_v4 = vsel %vm282_vm5, %v827_v22, 0.0  ;;  %v1602_v17 = vld [vmem:[%s1925_s28 + $0x220] sm:$0x3f] }
 0x1ed   : > { %v678_v2 = vmul.f32 %v1546_v59, %v665_v55  ;;  %v679_v39 = vmul.f32 %v1547_v0, %v665_v55  ;;  %v680_v46 = vmul.f32 %v1548_v1, %v665_v55  ;;  %v681_v14 = vmul.f32 %v1549_v27, %v665_v55  ;;  %v1614_v59 = vld [vmem:[%s1925_s28 + $0x520] sm:$0x3f]  ;;  %v1615_v1 = vld [vmem:[%s1925_s28 + $0x528] sm:$0x3f] }
 0x1ee   : > { %v690_v30 = vmul.f32 %v1558_v33, %v665_v55  ;;  %v691_v6 = vmul.f32 %v1559_v18, %v665_v55  ;;  %v2390_v15 = vsel %vm282_vm5, %v828_v42, 0.0  ;;  %v2393_v11 = vsel %vm282_vm5, %v829_v35, 0.0  ;;  %v1616_v42 = vld [vmem:[%s1925_s28 + $0x530] sm:$0x3f]  ;;  %v1617_v35 = vld [vmem:[%s1925_s28 + $0x538] sm:$0x3f] }
 0x1ef   : > { %v692_v31 = vmul.f32 %v1560_v19, %v665_v55  ;;  %v693_v23 = vmul.f32 %v1561_v28, %v665_v55  ;;  %v2398_v37 = vsel %vm282_vm5, %v838_v60, 0.0  ;;  %v2401_v10 = vsel %vm282_vm5, %v839_v40, 0.0  ;;  %v1556_v19 = vld [vmem:[%s1925_s28 + $0x170] sm:$0x3f] }
 0x1f0   : > { %v2404_v3 = vsel %vm282_vm5, %v840_v47, 0.0  ;;  %v2407_v22 = vsel %vm282_vm5, %v841_v41, 0.0  ;;  %v702_v55 = vadd.f32 %v2196_v21, %v678_v2  ;;  %v711_v0 = vadd.f32 %v2221_v26, %v679_v39  ;;  %v677_v21 = vpop.permute.xlu1 %676  ;;  %v1554_v26 = vld [vmem:[%s1925_s28 + $0x160] sm:$0x3f]  ;;  %v1555_v41 = vld [vmem:[%s1925_s28 + $0x168] sm:$0x3f] }
 0x1f1   : > { %v966_v27 = vmul.f32 %v1602_v17, %v957_v25  ;;  %v967_v33 = vmul.f32 %v1603_v20, %v957_v25  ;;  %v720_v18 = vadd.f32 %v2225_v51, %v680_v46  ;;  %v729_v60 = vadd.f32 %v2228_v52, %v681_v14  ;;  %v1557_v51 = vld [vmem:[%s1925_s28 + $0x178] sm:$0x3f]  ;;  %v1566_v52 = vld [vmem:[%s1925_s28 + $0x460] sm:$0x3f]  ;;  %v1567_v46 = vld [vmem:[%s1925_s28 + $0x468] sm:$0x3f] }
 0x1f2   : > { %v738_v40 = vadd.f32 %v2231_v53, %v690_v30  ;;  %v747_v47 = vadd.f32 %v2236_v62, %v691_v6  ;;  %v756_v28 = vadd.f32 %v2239_v63, %v692_v31  ;;  %v765_v2 = vadd.f32 %v2247_v58, %v693_v23  ;;  %v1568_v6 = vld [vmem:[%s1925_s28 + $0x470] sm:$0x3f]  ;;  %v1569_v20 = vld [vmem:[%s1925_s28 + $0x478] sm:$0x3f] }
 0x1f3   : > { %v2424_v39 = vmul.f32 %v1604_v32, %v957_v25  ;;  %v2426_v17 = vmul.f32 %v1605_v57, %v957_v25  ;;  %v2431_v53 = vmul.f32 %v1614_v59, %v957_v25  ;;  %v2433_v62 = vmul.f32 %v1615_v1, %v957_v25 }
 0x1f4   : > { %v2435_v14 = vmul.f32 %v1616_v42, %v957_v25  ;;  %v2437_v30 = vmul.f32 %v1617_v35, %v957_v25  ;;  %v2442_v63 = vsel %vm282_vm5, %v966_v27, 0.0  ;;  %v2445_v58 = vsel %vm282_vm5, %v967_v33, 0.0 }
 0x1f5   : > { %2953 = vst [vmem:[#allocation5_spill] sm:$0xff] %v2445_v58  ;;  %v686_v31 = vmul.f32 %v1554_v26, %v677_v21  ;;  %v687_v23 = vmul.f32 %v1555_v41, %v677_v21  ;;  %v688_v32 = vmul.f32 %v1556_v19, %v677_v21  ;;  %v689_v57 = vmul.f32 %v1557_v51, %v677_v21 }
 0x1f6   : > { %v698_v59 = vmul.f32 %v1566_v52, %v677_v21  ;;  %v699_v56 = vmul.f32 %v1567_v46, %v677_v21  ;;  %v700_v1 = vmul.f32 %v1568_v6, %v677_v21  ;;  %v701_v9 = vmul.f32 %v1569_v20, %v677_v21 }
 0x1f7   : > { %v703_v42 = vsel %vm282_vm5, %v686_v31, 0.0  ;;  %v712_v25 = vsel %vm282_vm5, %v687_v23, 0.0  ;;  %v721_v27 = vsel %vm282_vm5, %v688_v32, 0.0  ;;  %v730_v7 = vsel %vm282_vm5, %v689_v57, 0.0 }
 0x1f8   : > { %v704_v35 = vadd.f32 %v703_v42, %v702_v55  ;;  %v713_v24 = vadd.f32 %v712_v25, %v711_v0  ;;  %v722_v33 = vadd.f32 %v721_v27, %v720_v18  ;;  %v731_v58 = vadd.f32 %v730_v7, %v729_v60 }
 0x1f9   : > { %v739_v26 = vsel %vm282_vm5, %v698_v59, 0.0  ;;  %v748_v41 = vsel %vm282_vm5, %v699_v56, 0.0  ;;  %v757_v20 = vsel %vm282_vm5, %v700_v1, 0.0  ;;  %v766_v55 = vsel %vm282_vm5, %v701_v9, 0.0 }
 0x1fa   : > { %v705_v19 = vrot.slane %v704_v35, 4  ;;  %v714_v51 = vrot.slane %v713_v24, 4  ;;  %v740_v52 = vadd.f32 %v739_v26, %v738_v40  ;;  %v749_v21 = vadd.f32 %v748_v41, %v747_v47 }
 0x1fb   : > { %v723_v46 = vrot.slane %v722_v33, 4  ;;  %v732_v6 = vrot.slane %v731_v58, 4  ;;  %v758_v60 = vadd.f32 %v757_v20, %v756_v28  ;;  %v767_v57 = vadd.f32 %v766_v55, %v765_v2 }
 0x1fc   : > { %v706_v0 = vadd.f32 %v705_v19, %v704_v35  ;;  %v715_v31 = vadd.f32 %v714_v51, %v713_v24  ;;  %v741_v23 = vrot.slane %v740_v52, 4  ;;  %v750_v32 = vrot.slane %v749_v21, 4  ;;  %v2455_v24 = vpop.permute.xlu2 %1090 }
 0x1fd   : > { %v724_v7 = vadd.f32 %v723_v46, %v722_v33  ;;  %v733_v18 = vadd.f32 %v732_v6, %v731_v58  ;;  %v759_v27 = vrot.slane %v758_v60, 4  ;;  %v768_v26 = vrot.slane %v767_v57, 4 }
 0x1fe   : > { %v707_v56 = vrot.slane %v706_v0, 2  ;;  %v716_v59 = vrot.slane %v715_v31, 2  ;;  %v742_v42 = vadd.f32 %v741_v23, %v740_v52  ;;  %v751_v40 = vadd.f32 %v750_v32, %v749_v21 }
 0x1ff   : > { %v725_v47 = vrot.slane %v724_v7, 2  ;;  %v734_v25 = vrot.slane %v733_v18, 2  ;;  %v760_v33 = vadd.f32 %v759_v27, %v758_v60  ;;  %v769_v58 = vadd.f32 %v768_v26, %v767_v57 }
 0x200   : > { %v708_v1 = vadd.f32 %v707_v56, %v706_v0  ;;  %v717_v41 = vadd.f32 %v716_v59, %v715_v31  ;;  %v743_v9 = vrot.slane %v742_v42, 2  ;;  %v752_v35 = vrot.slane %v751_v40, 2 }
 0x201   : > { %v726_v19 = vadd.f32 %v725_v47, %v724_v7  ;;  %v735_v51 = vadd.f32 %v734_v25, %v733_v18  ;;  %v761_v20 = vrot.slane %v760_v33, 2  ;;  %v770_v55 = vrot.slane %v769_v58, 2  ;;  %v1622_v47 = vld [vmem:[%s1925_s28 + $0x260] sm:$0xff]  ;;  %v1623_v25 = vld [vmem:[%s1925_s28 + $0x268] sm:$0xff] }
 0x202   : > { %v709_v28 = vrot.slane %v708_v1, 1  ;;  %v718_v2 = vrot.slane %v717_v41, 1  ;;  %v744_v46 = vadd.f32 %v743_v9, %v742_v42  ;;  %v753_v6 = vadd.f32 %v752_v35, %v751_v40 }
 0x203   : > { %v727_v52 = vrot.slane %v726_v19, 1  ;;  %v736_v21 = vrot.slane %v735_v51, 1  ;;  %v762_v60 = vadd.f32 %v761_v20, %v760_v33  ;;  %v771_v57 = vadd.f32 %v770_v55, %v769_v58  ;;  %v1636_v33 = vld [vmem:[%s1925_s28 + $0x570] sm:$0xff]  ;;  %v811_v20 = vpop.permute.xlu1 %810  ;;  %v1574_v55 = vld [vmem:[%s1925_s28 + $0x1a0] sm:$0xff] }
 0x204   : > { %v710_v0 = vadd.f32 %v709_v28, %v708_v1  ;;  %v719_v31 = vadd.f32 %v718_v2, %v717_v41  ;;  %v745_v23 = vrot.slane %v744_v46, 1  ;;  %v754_v32 = vrot.slane %v753_v6, 1  ;;  %v1625_v41 = vld [vmem:[%s1925_s28 + $0x278] sm:$0xff]  ;;  %v1647_v2 = vld [vmem:[%s1925_s28 + $0x2c8] sm:$0xff] }
 0x205   : > { %v728_v7 = vadd.f32 %v727_v52, %v726_v19  ;;  %v737_v18 = vadd.f32 %v736_v21, %v735_v51  ;;  %v2459_v56 = vsel %vm282_vm5, %v2424_v39, 0.0  ;;  %v2463_v59 = vsel %vm282_vm5, %v2426_v17, 0.0  ;;  %v1624_v17 = vld [vmem:[%s1925_s28 + $0x270] sm:$0xff]  ;;  %v1634_v19 = vld [vmem:[%s1925_s28 + $0x560] sm:$0xff]  ;;  %v1635_v51 = vld [vmem:[%s1925_s28 + $0x568] sm:$0xff]  ;;  %v2521_v52 = vpop.permute.xlu2 %1230 }
 0x206   : > { %v746_v42 = vadd.f32 %v745_v23, %v744_v46  ;;  %v755_v40 = vadd.f32 %v754_v32, %v753_v6  ;;  %v2469_v27 = vsel %vm282_vm5, %v2431_v53, 0.0  ;;  %v2473_v26 = vsel %vm282_vm5, %v2433_v62, 0.0  ;;  %v1637_v28 = vld [vmem:[%s1925_s28 + $0x578] sm:$0xff]  ;;  %v1648_v21 = vld [vmem:[%s1925_s28 + $0x2d0] sm:$0xff] }
 0x207   : > { %v763_v39 = vrot.slane %v762_v60, 1  ;;  %v772_v1 = vrot.slane %v771_v57, 1  ;;  %v2479_v9 = vsel %vm282_vm5, %v2435_v14, 0.0  ;;  %v2483_v35 = vsel %vm282_vm5, %v2437_v30, 0.0  ;;  %v1576_v32 = vld [vmem:[%s1925_s28 + $0x1b0] sm:$0xff] }
 0x208   : > { %v2487_v53 = vsel %vm1352_vm8, %v2342_v54, %v710_v0  ;;  %v2491_v62 = vsel %vm1352_vm8, %v2346_v50, %v719_v31  ;;  %v2498_v30 = vsel %vm1352_vm8, %v2353_v44, %v728_v7  ;;  %v2502_v54 = vsel %vm1352_vm8, %v2357_v48, %v737_v18  ;;  %v1646_v50 = vld [vmem:[%s1925_s28 + $0x2c0] sm:$0xff]  ;;  %v1577_v7 = vld [vmem:[%s1925_s28 + $0x1b8] sm:$0xff] }
 0x209   : > { %v764_v14 = vadd.f32 %v763_v39, %v762_v60  ;;  %v773_v58 = vadd.f32 %v772_v1, %v771_v57  ;;  %v2509_v46 = vsel %vm1352_vm8, %v2360_v5, %v746_v42  ;;  %v2513_v6 = vsel %vm1352_vm8, %v2363_v8, %v755_v40  ;;  %v1575_v5 = vld [vmem:[%s1925_s28 + $0x1a8] sm:$0xff]  ;;  %v1586_v18 = vld [vmem:[%s1925_s28 + $0x4a0] sm:$0xff]  ;;  %v1589_v39 = vld [vmem:[%s1925_s28 + $0x4b8] sm:$0xff] }
 0x20a   : > { %v2516_v44 = vmul.f32 %v1622_v47, %v2455_v24  ;;  %v2519_v48 = vmul.f32 %v1623_v25, %v2455_v24  ;;  %v2527_v0 = vmul.f32 %v1624_v17, %v2455_v24  ;;  %v2530_v8 = vmul.f32 %v1625_v41, %v2455_v24  ;;  %v1587_v47 = vld [vmem:[%s1925_s28 + $0x4a8] sm:$0xff]  ;;  %v1588_v25 = vld [vmem:[%s1925_s28 + $0x4b0] sm:$0xff] }
 0x20b   : > { %v2533_v31 = vmul.f32 %v1634_v19, %v2455_v24  ;;  %v2536_v23 = vmul.f32 %v1635_v51, %v2455_v24  ;;  %v2543_v60 = vsel %vm1352_vm8, %v2370_v38, %v764_v14  ;;  %v2547_v57 = vsel %vm1352_vm8, %v2374_v49, %v773_v58 }
 0x20c   : > { %2954 = vst [vmem:[#allocation6_spill] sm:$0xff] %v2547_v57  ;;  %v2550_v42 = vmul.f32 %v1636_v33, %v2455_v24  ;;  %v2553_v40 = vmul.f32 %v1637_v28, %v2455_v24  ;;  %v2559_v1 = vmul.f32 %v1646_v50, %v2521_v52  ;;  %v2562_v17 = vmul.f32 %v1647_v2, %v2521_v52 }
 0x20d   : > { %v2565_v38 = vmul.f32 %v1648_v21, %v2521_v52  ;;  %v822_v49 = vmul.f32 %v1574_v55, %v811_v20  ;;  %v823_v41 = vmul.f32 %v1575_v5, %v811_v20  ;;  %v824_v19 = vmul.f32 %v1576_v32, %v811_v20 }
 0x20e   : > { %2955 = vst [vmem:[#allocation7_spill] sm:$0xff] %v2562_v17  ;;  %v825_v51 = vmul.f32 %v1577_v7, %v811_v20  ;;  %v834_v33 = vmul.f32 %v1586_v18, %v811_v20  ;;  %v835_v14 = vmul.f32 %v1587_v47, %v811_v20  ;;  %v836_v24 = vmul.f32 %v1588_v25, %v811_v20 }
 0x20f   : > { %v837_v58 = vmul.f32 %v1589_v39, %v811_v20  ;;  %v842_v28 = vadd.f32 %v822_v49, %v2284_v45  ;;  %v851_v57 = vadd.f32 %v823_v41, %v2287_v13  ;;  %v860_v50 = vadd.f32 %v824_v19, %v2290_v34 }
 0x210   : > { %v869_v2 = vadd.f32 %v825_v51, %v2294_v16  ;;  %v878_v17 = vadd.f32 %v834_v33, %v2326_v61  ;;  %v887_v55 = vadd.f32 %v835_v14, %v2329_v36  ;;  %v896_v5 = vadd.f32 %v836_v24, %v2332_v12 }
 0x211   : > { %v844_v21 = vadd.f32 %v2382_v43, %v842_v28  ;;  %v905_v32 = vadd.f32 %v837_v58, %v2335_v29  ;;  %v853_v20 = vadd.f32 %v2385_v4, %v851_v57  ;;  %v862_v45 = vadd.f32 %v2390_v15, %v860_v50 }
 0x212   : > { %v871_v13 = vadd.f32 %v2393_v11, %v869_v2  ;;  %v880_v34 = vadd.f32 %v2398_v37, %v878_v17  ;;  %v889_v16 = vadd.f32 %v2401_v10, %v887_v55  ;;  %v898_v61 = vadd.f32 %v2404_v3, %v896_v5  ;;  %v1649_v55 = vld [vmem:[%s1925_s28 + $0x2d8] sm:$0xff]  ;;  %v1658_v5 = vld [vmem:[%s1925_s28 + $0x5c0] sm:$0xff] }
 0x213   : > { %v845_v7 = vrot.slane %v844_v21, 4  ;;  %v907_v43 = vadd.f32 %v2407_v22, %v905_v32  ;;  %v854_v36 = vrot.slane %v853_v20, 4  ;;  %v863_v18 = vrot.slane %v862_v45, 4  ;;  %v1659_v32 = vld [vmem:[%s1925_s28 + $0x5c8] sm:$0xff] }
 0x214   : > { %v872_v12 = vrot.slane %v871_v13, 4  ;;  %v881_v47 = vrot.slane %v880_v34, 4  ;;  %v890_v25 = vrot.slane %v889_v16, 4  ;;  %v899_v4 = vrot.slane %v898_v61, 4 }
 0x215   : > { %v846_v29 = vadd.f32 %v845_v7, %v844_v21  ;;  %v908_v57 = vrot.slane %v907_v43, 4  ;;  %v855_v15 = vadd.f32 %v854_v36, %v853_v20  ;;  %v864_v39 = vadd.f32 %v863_v18, %v862_v45  ;;  %v1660_v7 = vld [vmem:[%s1925_s28 + $0x5d0] sm:$0xff] }
 0x216   : > { %v873_v11 = vadd.f32 %v872_v12, %v871_v13  ;;  %v882_v49 = vadd.f32 %v881_v47, %v880_v34  ;;  %v891_v17 = vadd.f32 %v890_v25, %v889_v16  ;;  %v900_v10 = vadd.f32 %v899_v4, %v898_v61  ;;  %v1661_v16 = vld [vmem:[%s1925_s28 + $0x5d8] sm:$0xff] }
 0x217   : > { %v847_v37 = vrot.slane %v846_v29, 2  ;;  %v909_v3 = vadd.f32 %v908_v57, %v907_v43  ;;  %v856_v22 = vrot.slane %v855_v15, 2  ;;  %v865_v41 = vrot.slane %v864_v39, 2 }
 0x218   : > { %v874_v19 = vrot.slane %v873_v11, 2  ;;  %v883_v51 = vrot.slane %v882_v49, 2  ;;  %v892_v14 = vrot.slane %v891_v17, 2  ;;  %v901_v24 = vrot.slane %v900_v10, 2 }
 0x219   : > { %v848_v33 = vadd.f32 %v847_v37, %v846_v29  ;;  %v910_v58 = vrot.slane %v909_v3, 2  ;;  %v857_v28 = vadd.f32 %v856_v22, %v855_v15  ;;  %v866_v50 = vadd.f32 %v865_v41, %v864_v39  ;;  %v951_v39 = vpop.permute.xlu1 %950  ;;  %v1600_v22 = vld [vmem:[%s1925_s28 + $0x210] sm:$0xff]  ;;  %v1601_v41 = vld [vmem:[%s1925_s28 + $0x218] sm:$0xff] }
 0x21a   : > { %v875_v2 = vadd.f32 %v874_v19, %v873_v11  ;;  %v884_v21 = vadd.f32 %v883_v51, %v882_v49  ;;  %v893_v45 = vadd.f32 %v892_v14, %v891_v17  ;;  %v902_v13 = vadd.f32 %v901_v24, %v900_v10  ;;  %v1598_v11 = vld [vmem:[%s1925_s28 + $0x200] sm:$0xff]  ;;  %v1599_v49 = vld [vmem:[%s1925_s28 + $0x208] sm:$0xff] }
 0x21b   : > { %v849_v20 = vrot.slane %v848_v33, 1  ;;  %v911_v34 = vadd.f32 %v910_v58, %v909_v3  ;;  %v858_v61 = vrot.slane %v857_v28, 1  ;;  %v867_v43 = vrot.slane %v866_v50, 1  ;;  %v1610_v19 = vld [vmem:[%s1925_s28 + $0x500] sm:$0xff]  ;;  %v1611_v58 = vld [vmem:[%s1925_s28 + $0x508] sm:$0xff] }
 0x21c   : > { %v876_v36 = vrot.slane %v875_v2, 1  ;;  %v885_v18 = vrot.slane %v884_v21, 1  ;;  %v894_v47 = vrot.slane %v893_v45, 1  ;;  %v903_v29 = vrot.slane %v902_v13, 1 }
 0x21d   : > { %v850_v12 = vadd.f32 %v849_v20, %v848_v33  ;;  %v912_v25 = vrot.slane %v911_v34, 1  ;;  %v2589_v4 = vmul.f32 %v1649_v55, %v2521_v52  ;;  %v2592_v57 = vmul.f32 %v1658_v5, %v2521_v52  ;;  %v1613_v55 = vld [vmem:[%s1925_s28 + $0x518] sm:$0xff] }
 0x21e   : > { %v859_v15 = vadd.f32 %v858_v61, %v857_v28  ;;  %v2597_v37 = vmul.f32 %v1659_v32, %v2521_v52  ;;  %v2600_v17 = vmul.f32 %v1660_v7, %v2521_v52  ;;  %v2603_v10 = vmul.f32 %v1661_v16, %v2521_v52  ;;  %v1612_v28 = vld [vmem:[%s1925_s28 + $0x510] sm:$0xff]  ;;  %v2956_v61 = vld [vmem:[#allocation9_spill] sm:$0xff] }
 0x21f   : > { %v2605_v3 = vadd.f32 %v867_v43, %v866_v50  ;;  %v2610_v51 = vadd.f32 %v876_v36, %v875_v2  ;;  %v2612_v33 = vadd.f32 %v885_v18, %v884_v21  ;;  %v2614_v14 = vadd.f32 %v894_v47, %v893_v45  ;;  %v2958_v18 = vld [vmem:[#allocation11_spill] sm:$0xff] }
 0x220   : > { %v2616_v24 = vadd.f32 %v903_v29, %v902_v13  ;;  %v2621_v5 = vadd.f32 %v912_v25, %v911_v34  ;;  %v2625_v52 = vsel %vm1361_vm9, %v2487_v53, %v850_v12  ;;  %v2629_v50 = vsel %vm1361_vm9, %v2491_v62, %v859_v15  ;;  %v2957_v34 = vld [vmem:[#allocation10_spill] sm:$0xff]  ;;  %v2959_v53 = vld [vmem:[#allocation12_spill] sm:$0xff]  ;;  %v2960_v29 = vld [vmem:[#allocation13_spill] sm:$0xff] }
 0x221   : > { %v962_v2 = vmul.f32 %v1598_v11, %v951_v39  ;;  %v963_v21 = vmul.f32 %v1599_v49, %v951_v39  ;;  %v964_v32 = vmul.f32 %v1600_v22, %v951_v39  ;;  %v965_v20 = vmul.f32 %v1601_v41, %v951_v39  ;;  %v2961_v15 = vld [vmem:[#allocation14_spill] sm:$0xff]  ;;  %v2962_v49 = vld [vmem:[#allocation15_spill] sm:$0xff]  ;;  %v2963_v41 = vld [vmem:[#allocation16_spill] sm:$0xff] }
 0x222   : > { %v974_v45 = vmul.f32 %v1610_v19, %v951_v39  ;;  %v975_v13 = vmul.f32 %v1611_v58, %v951_v39  ;;  %v976_v7 = vmul.f32 %v1612_v28, %v951_v39  ;;  %v977_v16 = vmul.f32 %v1613_v55, %v951_v39  ;;  %v2964_v58 = vld [vmem:[#allocation5_spill] sm:$0xff] }
 0x223   : > { %v982_v43 = vadd.f32 %v962_v2, %v2956_v61  ;;  %v991_v36 = vadd.f32 %v963_v21, %v2957_v34  ;;  %v1000_v47 = vadd.f32 %v964_v32, %v2958_v18  ;;  %v1009_v12 = vadd.f32 %v965_v20, %v2959_v53 }
 0x224   : > { %v1018_v25 = vadd.f32 %v974_v45, %v2960_v29  ;;  %v1027_v11 = vadd.f32 %v975_v13, %v2961_v15  ;;  %v1036_v22 = vadd.f32 %v976_v7, %v2962_v49  ;;  %v1045_v19 = vadd.f32 %v977_v16, %v2963_v41 }
 0x225   : > { %v984_v62 = vadd.f32 %v2442_v63, %v982_v43  ;;  %v993_v39 = vadd.f32 %v2964_v58, %v991_v36  ;;  %v1002_v28 = vadd.f32 %v2459_v56, %v1000_v47  ;;  %v1011_v55 = vadd.f32 %v2463_v59, %v1009_v12 }
 0x226   : > { %v1020_v2 = vadd.f32 %v2469_v27, %v1018_v25  ;;  %v1029_v32 = vadd.f32 %v2473_v26, %v1027_v11  ;;  %v1038_v20 = vadd.f32 %v2479_v9, %v1036_v22  ;;  %v1047_v63 = vadd.f32 %v2483_v35, %v1045_v19 }
 0x227   : > { %v985_v21 = vrot.slane %v984_v62, 4  ;;  %v994_v45 = vrot.slane %v993_v39, 4  ;;  %v1003_v13 = vrot.slane %v1002_v28, 4  ;;  %v1012_v7 = vrot.slane %v1011_v55, 4 }
 0x228   : > { %v1021_v61 = vrot.slane %v1020_v2, 4  ;;  %v1030_v43 = vrot.slane %v1029_v32, 4  ;;  %v1039_v34 = vrot.slane %v1038_v20, 4  ;;  %v1048_v36 = vrot.slane %v1047_v63, 4 }
 0x229   : > { %v986_v16 = vadd.f32 %v985_v21, %v984_v62  ;;  %v995_v56 = vadd.f32 %v994_v45, %v993_v39  ;;  %v1004_v18 = vadd.f32 %v1003_v13, %v1002_v28  ;;  %v1013_v59 = vadd.f32 %v1012_v7, %v1011_v55  ;;  %v1085_v45 = vpop.permute.xlu1 %1084  ;;  %v1618_v13 = vld [vmem:[%s1925_s28 + $0x240] sm:$0xff]  ;;  %v1619_v7 = vld [vmem:[%s1925_s28 + $0x248] sm:$0xff] }
 0x22a   : > { %v1022_v47 = vadd.f32 %v1021_v61, %v1020_v2  ;;  %v1031_v53 = vadd.f32 %v1030_v43, %v1029_v32  ;;  %v1040_v12 = vadd.f32 %v1039_v34, %v1038_v20  ;;  %v1049_v26 = vadd.f32 %v1048_v36, %v1047_v63  ;;  %v1630_v43 = vld [vmem:[%s1925_s28 + $0x540] sm:$0xff] }
 0x22b   : > { %v987_v27 = vrot.slane %v986_v16, 2  ;;  %v996_v29 = vrot.slane %v995_v56, 2  ;;  %v1005_v9 = vrot.slane %v1004_v18, 2  ;;  %v1014_v25 = vrot.slane %v1013_v59, 2 }
 0x22c   : > { %v1023_v35 = vrot.slane %v1022_v47, 2  ;;  %v1032_v11 = vrot.slane %v1031_v53, 2  ;;  %v1041_v49 = vrot.slane %v1040_v12, 2  ;;  %v1050_v62 = vrot.slane %v1049_v26, 2 }
 0x22d   : > { %v988_v15 = vadd.f32 %v987_v27, %v986_v16  ;;  %v997_v22 = vadd.f32 %v996_v29, %v995_v56  ;;  %v1006_v41 = vadd.f32 %v1005_v9, %v1004_v18  ;;  %v2647_v19 = vadd.f32 %v1014_v25, %v1013_v59  ;;  %v1621_v16 = vld [vmem:[%s1925_s28 + $0x258] sm:$0xff] }
 0x22e   : > { %v2649_v58 = vadd.f32 %v1023_v35, %v1022_v47  ;;  %v2651_v28 = vadd.f32 %v1032_v11, %v1031_v53  ;;  %v2653_v55 = vadd.f32 %v1041_v49, %v1040_v12  ;;  %v2655_v2 = vadd.f32 %v1050_v62, %v1049_v26  ;;  %v1633_v56 = vld [vmem:[%s1925_s28 + $0x558] sm:$0xff]  ;;  %v2966_v62 = vld [vmem:[#allocation17_spill] sm:$0xff] }
 0x22f   : > { %v989_v39 = vrot.slane %v988_v15, 1  ;;  %v2660_v21 = vsel %vm1361_vm9, %v2498_v30, %v2605_v3  ;;  %v2665_v32 = vsel %vm1361_vm9, %v2502_v54, %v2610_v51  ;;  %v998_v20 = vrot.slane %v997_v22, 1  ;;  %v1620_v51 = vld [vmem:[%s1925_s28 + $0x250] sm:$0xff] }
 0x230   : > { %v1007_v63 = vrot.slane %v1006_v41, 1  ;;  %v2672_v61 = vsel %vm1361_vm9, %v2509_v46, %v2612_v33  ;;  %v2677_v30 = vsel %vm1361_vm9, %v2513_v6, %v2614_v14  ;;  %v2682_v54 = vsel %vm1361_vm9, %v2543_v60, %v2616_v24  ;;  %v1631_v6 = vld [vmem:[%s1925_s28 + $0x548] sm:$0xff]  ;;  %v1632_v14 = vld [vmem:[%s1925_s28 + $0x550] sm:$0xff] }
 0x231   : > { %2965 = vst [vmem:[#allocation8_spill] sm:$0xff] %v2682_v54  ;;  %v1016_v3 = vrot.slane %v2647_v19, 1  ;;  %v2688_v34 = vadd.f32 %v989_v39, %v988_v15  ;;  %v1025_v46 = vrot.slane %v2649_v58, 1  ;;  %v1034_v33 = vrot.slane %v2651_v28, 1 }
 0x232   : > { %v1043_v36 = vrot.slane %v2653_v55, 1  ;;  %v2696_v18 = vadd.f32 %v998_v20, %v997_v22  ;;  %v2698_v60 = vadd.f32 %v1007_v63, %v1006_v41  ;;  %v1052_v24 = vrot.slane %v2655_v2, 1  ;;  %v2967_v63 = vld [vmem:[#allocation18_spill] sm:$0xff] }
 0x233   : > { %v1098_v59 = vmul.f32 %v1618_v13, %v1085_v45  ;;  %v1099_v47 = vmul.f32 %v1619_v7, %v1085_v45  ;;  %v1100_v27 = vmul.f32 %v1620_v51, %v1085_v45  ;;  %v1101_v53 = vmul.f32 %v1621_v16, %v1085_v45  ;;  %v2968_v13 = vld [vmem:[#allocation19_spill] sm:$0xff]  ;;  %v2969_v7 = vld [vmem:[#allocation20_spill] sm:$0xff]  ;;  %v2970_v51 = vld [vmem:[#allocation21_spill] sm:$0xff] }
 0x234   : > { %v1110_v12 = vmul.f32 %v1630_v43, %v1085_v45  ;;  %v1111_v26 = vmul.f32 %v1631_v6, %v1085_v45  ;;  %v1112_v29 = vmul.f32 %v1632_v14, %v1085_v45  ;;  %v1113_v9 = vmul.f32 %v1633_v56, %v1085_v45  ;;  %v2973_v14 = vld [vmem:[#allocation24_spill] sm:$0xff] }
 0x235   : > { %v1122_v25 = vadd.f32 %v2516_v44, %v1098_v59  ;;  %v1131_v35 = vadd.f32 %v2519_v48, %v1099_v47  ;;  %v1140_v15 = vadd.f32 %v2527_v0, %v1100_v27  ;;  %v1149_v11 = vadd.f32 %v2530_v8, %v1101_v53  ;;  %v2971_v8 = vld [vmem:[#allocation22_spill] sm:$0xff] }
 0x236   : > { %v1158_v49 = vadd.f32 %v2533_v31, %v1110_v12  ;;  %v1167_v41 = vadd.f32 %v2536_v23, %v1111_v26  ;;  %v1176_v39 = vadd.f32 %v2550_v42, %v1112_v29  ;;  %v1185_v20 = vadd.f32 %v2553_v40, %v1113_v9  ;;  %v2972_v31 = vld [vmem:[#allocation23_spill] sm:$0xff] }
 0x237   : > { %v1124_v22 = vadd.f32 %v2966_v62, %v1122_v25  ;;  %v1133_v45 = vadd.f32 %v2967_v63, %v1131_v35  ;;  %v1142_v44 = vadd.f32 %v2968_v13, %v1140_v15  ;;  %v1151_v48 = vadd.f32 %v2969_v7, %v1149_v11  ;;  %v1225_v62 = vpop.permute.xlu1 %1224 }
 0x238   : > { %v1160_v0 = vadd.f32 %v2970_v51, %v1158_v49  ;;  %v1169_v43 = vadd.f32 %v2971_v8, %v1167_v41  ;;  %v1178_v6 = vadd.f32 %v2972_v31, %v1176_v39  ;;  %v1187_v56 = vadd.f32 %v2973_v14, %v1185_v20  ;;  %v1643_v14 = vld [vmem:[%s1925_s28 + $0x2a8] sm:$0xff] }
 0x239   : > { %v1125_v16 = vrot.slane %v1124_v22, 4  ;;  %v1134_v23 = vrot.slane %v1133_v45, 4  ;;  %v1143_v59 = vrot.slane %v1142_v44, 4  ;;  %v1152_v42 = vrot.slane %v1151_v48, 4 }
 0x23a   : > { %v1161_v47 = vrot.slane %v1160_v0, 4  ;;  %v1170_v27 = vrot.slane %v1169_v43, 4  ;;  %v1179_v53 = vrot.slane %v1178_v6, 4  ;;  %v1188_v12 = vrot.slane %v1187_v56, 4 }
 0x23b   : > { %v1126_v40 = vadd.f32 %v1125_v16, %v1124_v22  ;;  %v1135_v26 = vadd.f32 %v1134_v23, %v1133_v45  ;;  %v1144_v29 = vadd.f32 %v1143_v59, %v1142_v44  ;;  %v1153_v9 = vadd.f32 %v1152_v42, %v1151_v48 }
 0x23c   : > { %v1162_v25 = vadd.f32 %v1161_v47, %v1160_v0  ;;  %v1171_v15 = vadd.f32 %v1170_v27, %v1169_v43  ;;  %v1180_v11 = vadd.f32 %v1179_v53, %v1178_v6  ;;  %v1189_v49 = vadd.f32 %v1188_v12, %v1187_v56  ;;  %v1642_v6 = vld [vmem:[%s1925_s28 + $0x2a0] sm:$0xff]  ;;  %v1644_v47 = vld [vmem:[%s1925_s28 + $0x2b0] sm:$0xff] }
 0x23d   : > { %v1127_v35 = vrot.slane %v1126_v40, 2  ;;  %v1136_v41 = vrot.slane %v1135_v26, 2  ;;  %v1145_v39 = vrot.slane %v1144_v29, 2  ;;  %v1154_v20 = vrot.slane %v1153_v9, 2 }
 0x23e   : > { %v1163_v63 = vrot.slane %v1162_v25, 2  ;;  %v1172_v22 = vrot.slane %v1171_v15, 2  ;;  %v1181_v7 = vrot.slane %v1180_v11, 2  ;;  %v1190_v51 = vrot.slane %v1189_v49, 2 }
 0x23f   : > { %v1128_v13 = vadd.f32 %v1127_v35, %v1126_v40  ;;  %v1137_v45 = vadd.f32 %v1136_v41, %v1135_v26  ;;  %v1146_v44 = vadd.f32 %v1145_v39, %v1144_v29  ;;  %v1155_v48 = vadd.f32 %v1154_v20, %v1153_v9  ;;  %v1645_v40 = vld [vmem:[%s1925_s28 + $0x2b8] sm:$0xff]  ;;  %v1654_v29 = vld [vmem:[%s1925_s28 + $0x5a0] sm:$0xff] }
 0x240   : > { %v1164_v0 = vadd.f32 %v1163_v63, %v1162_v25  ;;  %v2717_v8 = vadd.f32 %v1172_v22, %v1171_v15  ;;  %v2719_v43 = vadd.f32 %v1181_v7, %v1180_v11  ;;  %v2721_v31 = vadd.f32 %v1190_v51, %v1189_v49  ;;  %v1237_v15 = vpop.permute.xlu1 %1236  ;;  %v1652_v11 = vld [vmem:[%s1925_s28 + $0x2f0] sm:$0x3f]  ;;  %v1653_v49 = vld [vmem:[%s1925_s28 + $0x2f8] sm:$0x3f]  ;;  %v1663_v22 = vld [vmem:[%s1925_s28 + $0x5e8] sm:$0x3f] }
 0x241   : > { %v1129_v16 = vrot.slane %v1128_v13, 1  ;;  %v1138_v56 = vrot.slane %v1137_v45, 1  ;;  %v1147_v23 = vrot.slane %v1146_v44, 1  ;;  %v1156_v59 = vrot.slane %v1155_v48, 1  ;;  %v1664_v7 = vld [vmem:[%s1925_s28 + $0x5f0] sm:$0x3f] }
 0x242   : > { %v1165_v42 = vrot.slane %v1164_v0, 1  ;;  %v2730_v27 = vadd.f32 %v1016_v3, %v2647_v19  ;;  %v2735_v53 = vadd.f32 %v1025_v46, %v2649_v58  ;;  %v2740_v12 = vadd.f32 %v1034_v33, %v2651_v28  ;;  %v1655_v19 = vld [vmem:[%s1925_s28 + $0x5a8] sm:$0xff]  ;;  %v1656_v3 = vld [vmem:[%s1925_s28 + $0x5b0] sm:$0xff] }
 0x243   : > { %v2745_v26 = vadd.f32 %v1043_v36, %v2653_v55  ;;  %v2753_v58 = vadd.f32 %v1052_v24, %v2655_v2  ;;  %v2755_v46 = vadd.f32 %v1129_v16, %v1128_v13  ;;  %v1650_v55 = vld [vmem:[%s1925_s28 + $0x2e0] sm:$0x3f]  ;;  %v1651_v36 = vld [vmem:[%s1925_s28 + $0x2e8] sm:$0x3f]  ;;  %v2761_v9 = vadd.f32 %v1138_v56, %v1137_v45  ;;  %v1657_v24 = vld [vmem:[%s1925_s28 + $0x5b8] sm:$0xff] }
 0x244   : > { %v2763_v25 = vadd.f32 %v1147_v23, %v1146_v44  ;;  %v2765_v35 = vadd.f32 %v1156_v59, %v1155_v48  ;;  %v2771_v41 = vadd.f32 %v1165_v42, %v1164_v0  ;;  %v1238_v39 = vmul.f32 %v1642_v6, %v1225_v62  ;;  %v1662_v13 = vld [vmem:[%s1925_s28 + $0x5e0] sm:$0x3f]  ;;  %v1665_v16 = vld [vmem:[%s1925_s28 + $0x5f8] sm:$0x3f] }
 0x245   : > { %2974 = vst [vmem:[#allocation9_spill] sm:$0xff] %v2753_v58  ;;  %v1239_v20 = vmul.f32 %v1643_v14, %v1225_v62  ;;  %v1240_v63 = vmul.f32 %v1644_v47, %v1225_v62  ;;  %v1241_v51 = vmul.f32 %v1645_v40, %v1225_v62  ;;  %v1250_v45 = vmul.f32 %v1654_v29, %v1225_v62  ;;  %v2975_v47 = vld [vmem:[#allocation7_spill] sm:$0xff] }
 0x246   : > { %v1251_v44 = vmul.f32 %v1655_v19, %v1225_v62  ;;  %v1252_v48 = vmul.f32 %v1656_v3, %v1225_v62  ;;  %v1253_v56 = vmul.f32 %v1657_v24, %v1225_v62  ;;  %v1246_v23 = vmul.f32 %v1650_v55, %v1237_v15 }
 0x247   : > { %v1247_v59 = vmul.f32 %v1651_v36, %v1237_v15  ;;  %v1248_v2 = vmul.f32 %v1652_v11, %v1237_v15  ;;  %v1249_v33 = vmul.f32 %v1653_v49, %v1237_v15  ;;  %v1258_v28 = vmul.f32 %v1662_v13, %v1237_v15 }
 0x248   : > { %v1259_v58 = vmul.f32 %v1663_v22, %v1237_v15  ;;  %v1260_v0 = vmul.f32 %v1664_v7, %v1237_v15  ;;  %v1261_v42 = vmul.f32 %v1665_v16, %v1237_v15  ;;  %v1262_v6 = vadd.f32 %v2559_v1, %v1238_v39 }
 0x249   : > { %v1263_v14 = vsel %vm282_vm5, %v1246_v23, 0.0  ;;  %v1271_v54 = vadd.f32 %v2975_v47, %v1239_v20  ;;  %v1272_v40 = vsel %vm282_vm5, %v1247_v59, 0.0  ;;  %v1280_v29 = vadd.f32 %v2565_v38, %v1240_v63 }
 0x24a   : > { %v1281_v62 = vsel %vm282_vm5, %v1248_v2, 0.0  ;;  %v1289_v19 = vadd.f32 %v2589_v4, %v1241_v51  ;;  %v1264_v3 = vadd.f32 %v1263_v14, %v1262_v6  ;;  %v1290_v36 = vsel %vm282_vm5, %v1249_v33, 0.0 }
 0x24b   : > { %v1273_v55 = vadd.f32 %v1272_v40, %v1271_v54  ;;  %v1298_v24 = vadd.f32 %v2592_v57, %v1250_v45  ;;  %v1282_v15 = vadd.f32 %v1281_v62, %v1280_v29  ;;  %v1299_v11 = vsel %vm282_vm5, %v1258_v28, 0.0 }
 0x24c   : > { %v1291_v1 = vadd.f32 %v1290_v36, %v1289_v19  ;;  %v1307_v49 = vadd.f32 %v2597_v37, %v1251_v44  ;;  %v1265_v39 = vrot.slane %v1264_v3, 4  ;;  %v1308_v38 = vsel %vm282_vm5, %v1259_v58, 0.0 }
 0x24d   : > { %v1274_v20 = vrot.slane %v1273_v55, 4  ;;  %v1300_v13 = vadd.f32 %v1299_v11, %v1298_v24  ;;  %v1283_v2 = vrot.slane %v1282_v15, 4  ;;  %v1316_v54 = vadd.f32 %v2600_v17, %v1252_v48 }
 0x24e   : > { %v1292_v63 = vrot.slane %v1291_v1, 4  ;;  %v1309_v4 = vadd.f32 %v1308_v38, %v1307_v49  ;;  %v1266_v22 = vadd.f32 %v1265_v39, %v1264_v3  ;;  %v1317_v57 = vsel %vm282_vm5, %v1260_v0, 0.0 }
 0x24f   : > { %v1275_v33 = vadd.f32 %v1274_v20, %v1273_v55  ;;  %v1301_v7 = vrot.slane %v1300_v13, 4  ;;  %v1284_v51 = vadd.f32 %v1283_v2, %v1282_v15  ;;  %v1318_v16 = vadd.f32 %v1317_v57, %v1316_v54 }
 0x250   : > { %v1293_v45 = vadd.f32 %v1292_v63, %v1291_v1  ;;  %v1310_v28 = vrot.slane %v1309_v4, 4  ;;  %v1267_v37 = vrot.slane %v1266_v22, 2  ;;  %v1325_v59 = vadd.f32 %v2603_v10, %v1253_v56 }
 0x251   : > { %v1276_v44 = vrot.slane %v1275_v33, 2  ;;  %v1302_v23 = vadd.f32 %v1301_v7, %v1300_v13  ;;  %v1285_v58 = vrot.slane %v1284_v51, 2  ;;  %v1319_v47 = vrot.slane %v1318_v16, 4 }
 0x252   : > { %v1294_v6 = vrot.slane %v1293_v45, 2  ;;  %v1311_v14 = vadd.f32 %v1310_v28, %v1309_v4  ;;  %v1268_v40 = vadd.f32 %v1267_v37, %v1266_v22  ;;  %v1326_v29 = vsel %vm282_vm5, %v1261_v42, 0.0 }
 0x253   : > { %v1277_v17 = vadd.f32 %v1276_v44, %v1275_v33  ;;  %v1303_v48 = vrot.slane %v1302_v23, 2  ;;  %v1286_v62 = vadd.f32 %v1285_v58, %v1284_v51  ;;  %v1320_v3 = vadd.f32 %v1319_v47, %v1318_v16 }
 0x254   : > { %v1295_v0 = vadd.f32 %v1294_v6, %v1293_v45  ;;  %v1312_v19 = vrot.slane %v1311_v14, 2  ;;  %v1269_v55 = vrot.slane %v1268_v40, 1  ;;  %v1327_v15 = vadd.f32 %v1326_v29, %v1325_v59 }
 0x255   : > { %v1278_v36 = vrot.slane %v1277_v17, 1  ;;  %v1304_v24 = vadd.f32 %v1303_v48, %v1302_v23  ;;  %v1287_v1 = vrot.slane %v1286_v62, 1  ;;  %v1321_v11 = vrot.slane %v1320_v3, 2 }
 0x256   : > { %v1296_v10 = vrot.slane %v1295_v0, 1  ;;  %v1313_v56 = vadd.f32 %v1312_v19, %v1311_v14  ;;  %v2976_v49 = vrot.slane %v2717_v8, 1  ;;  %v2977_v42 = vrot.slane %v2719_v43, 1  ;;  %v2981_v14 = vld [vmem:[#allocation9_spill] sm:$0xff] }
 0x257   : > { %v1305_v13 = vrot.slane %v1304_v24, 1  ;;  %v1328_v38 = vrot.slane %v1327_v15, 4  ;;  %v2978_v2 = vrot.slane %v2721_v31, 1  ;;  %v1322_v54 = vadd.f32 %v1321_v11, %v1320_v3 }
 0x258   : > { %v1175_v39 = vadd.f32 %v2976_v49, %v2717_v8  ;;  %v1184_v20 = vadd.f32 %v2977_v42, %v2719_v43  ;;  %v1314_v4 = vrot.slane %v1313_v56, 1  ;;  %v1270_v22 = vadd.f32 %v1269_v55, %v1268_v40 }
 0x259   : > { %v1193_v63 = vadd.f32 %v2978_v2, %v2721_v31  ;;  %v1279_v33 = vadd.f32 %v1278_v36, %v1277_v17  ;;  %v1329_v7 = vadd.f32 %v1328_v38, %v1327_v15  ;;  %v1288_v8 = vadd.f32 %v1287_v1, %v1286_v62 }
 0x25a   : > { %v1297_v57 = vadd.f32 %v1296_v10, %v1295_v0  ;;  %v1306_v51 = vadd.f32 %v1305_v13, %v1304_v24  ;;  %v1323_v45 = vrot.slane %v1322_v54, 1  ;;  %v1315_v43 = vadd.f32 %v1314_v4, %v1313_v56 }
 0x25b   : > { %v1330_v28 = vrot.slane %v1329_v7, 2  ;;  %v1371_v16 = vsel %vm1370_vm10, %v2625_v52, %v2688_v34  ;;  %v1372_v31 = vsel %vm1370_vm10, %v2629_v50, %v2696_v18  ;;  %v1373_v37 = vsel %vm1370_vm10, %v2660_v21, %v2698_v60 }
 0x25c   : > { %v1374_v44 = vsel %vm1370_vm10, %v2665_v32, %v2730_v27  ;;  %v1375_v23 = vsel %vm1370_vm10, %v2672_v61, %v2735_v53  ;;  %v1376_v52 = vsel %vm1370_vm10, %v2677_v30, %v2740_v12  ;;  %v1324_v34 = vadd.f32 %v1323_v45, %v1322_v54 }
 0x25d   : > { %v1331_v59 = vadd.f32 %v1330_v28, %v1329_v7  ;;  %v1379_v50 = vsel %vm282_vm5, %v1371_v16, %v2755_v46  ;;  %v1380_v21 = vsel %vm282_vm5, %v1372_v31, %v2761_v9  ;;  %v1381_v18 = vsel %vm282_vm5, %v1373_v37, %v2763_v25  ;;  %v2979_v46 = vld [vmem:[#allocation6_spill] sm:$0xff]  ;;  %v2980_v25 = vld [vmem:[#allocation8_spill] sm:$0xff] }
 0x25e   : > { %v1382_v32 = vsel %vm282_vm5, %v1374_v44, %v2765_v35  ;;  %v1383_v61 = vsel %vm282_vm5, %v1375_v23, %v2771_v41  ;;  %v1388_v60 = vsel %vm1387_vm11, %v1379_v50, %v1270_v22  ;;  %v1389_v27 = vsel %vm1387_vm11, %v1380_v21, %v1279_v33 }
 0x25f   : > { %v1332_v30 = vrot.slane %v1331_v59, 1  ;;  %v1390_v53 = vsel %vm1387_vm11, %v1381_v18, %v1288_v8  ;;  %v1391_v12 = vsel %vm1387_vm11, %v1382_v32, %v1297_v57  ;;  %1396 = vst [vmem:[%s2836_s3] sm:$0xff] %v1388_v60  ;;  %v1369_v9 = vsel %vm1361_vm9, %v2979_v46, %v2621_v5 }
 0x260   : > { %v1377_v35 = vsel %vm1370_vm10, %v2980_v25, %v2745_v26  ;;  %v1384_v41 = vsel %vm282_vm5, %v1376_v52, %v1175_v39  ;;  %v1392_v58 = vsel %vm1387_vm11, %v1383_v61, %v1306_v51  ;;  %1397 = vst [vmem:[%s2836_s3 + $0x8] sm:$0xff] %v1389_v27  ;;  %v1378_v47 = vsel %vm1370_vm10, %v1369_v9, %v2981_v14 }
 0x261   : > { %v1333_v6 = vadd.f32 %v1332_v30, %v1331_v59  ;;  %v1385_v40 = vsel %vm282_vm5, %v1377_v35, %v1184_v20  ;;  %v1393_v5 = vsel %vm1387_vm11, %v1384_v41, %v1315_v43  ;;  %1398 = vst [vmem:[%s2836_s3 + $0x10] sm:$0xff] %v1390_v53  ;;  %v1386_v17 = vsel %vm282_vm5, %v1378_v47, %v1193_v63 }
 0x262   : > { %v1394_v26 = vsel %vm1387_vm11, %v1385_v40, %v1324_v34  ;;  %1399 = vst [vmem:[%s2836_s3 + $0x18] sm:$0xff] %v1391_v12  ;;  %1411 = sbr.rel (!%p1875_p5) target bundleno = 646 (0x286), region = 32 }
 0x263   : > { %v1395_v48 = vsel %vm1387_vm11, %v1386_v17, %v1333_v6  ;;  %1400 = vst [vmem:[%s2836_s3 + $0x20] sm:$0xff] %v1392_v58 }
 0x264   : > { %1401 = vst [vmem:[%s2836_s3 + $0x28] sm:$0xff] %v1393_v5 }
 0x265   : > { %1402 = vst [vmem:[%s2836_s3 + $0x30] sm:$0xff] %v1394_v26 }
 0x266   : > { %1403 = vst [vmem:[%s2836_s3 + $0x38] sm:$0xff] %v1395_v48 }
 0x267   : > { %s2988_s5 = smov (!%p1414_p11, %s1413_s5), 2 }
 0x268   : > { %s1677_s6 = sshll.u32 %s2988_s5, 5 }
 0x269   : > { %s1418_s7 = ssub.s32 64, %s1677_s6 }
 0x26a   : > { %s1419_s8 = sshll.u32 %s1418_s7, 4 }
 0x26b   : > { %1420 = vsyncadd %s2863_s4, %s1419_s8  ;;  %p2872_p12 = scmp.ne.s32.totalorder %s1677_s6, 0  ;;  %s1679_s16 = sshll.u32 %s1858_s13, 6 }
 0x26c   : > { %s1424_s21 = scalar_lea.hbm %s2926_s2, %s1679_s16  ;;  %s1426_s22 = sshll.u32 %s2836_s3, 4  ;;  %s2881_s22 = int_to_ptr.vmem [resolvable:$true] %s1426_s22 }
 0x26d   : > { %s1428_s23 = sshll.u32 %s1424_s21, 4  ;;  %s1674_s24 = sshll.u32 %s2988_s5, 9  ;;  %s2883_s23 = int_to_ptr.hbm [resolvable:$true] %s1428_s23 }
 0x26e   : > { %s1744_s25 = sshra.s32 %s2881_s22, 4  ;;  %s1746_s26 = sshrl.u32 %s1674_s24, 4  ;;  %s1745_s25 = int_to_ptr.vmem [resolvable:$true] %s1744_s25 }
 0x26f   : > { %s1751_s27 = scalar_lea.vmem %s1745_s25, %s1746_s26  ;;  %s1819_s13 = smov [#allocation2]  }
 0x270   : > { %p1752_p13 = scmp.ne.s32.totalorder %s1745_s25, %s1751_s27  ;;  %s1755_s28 = scalar_lea.vmem %s1819_s13, 128 }
 0x271   : > { %p1757_p2 = scmp.lt.s32.totalorder %s1755_s28, %s1751_s27 }
 0x272   : > { %p1753_p0 = pnand %p1752_p13, %p2872_p12 }
 0x274   : > { %p1754_p1 = pneg %p1753_p0 }
 0x276   : > { %p1759_p3 = pnand %p1757_p2, %p1754_p1 }
 0x278   : > { %1762 = shalt.err (!%p1759_p3)
}
 0x279   : > { %s1763_s29 = sshra.s32 %s2883_s23, 4  ;;  %s1774_s7 = scalar_lea.hbm %s2926_s2, 160  ;;  %s1764_s29 = int_to_ptr.hbm [resolvable:$true] %s1763_s29 }
 0x27a   : > { %s1770_s30 = scalar_lea.hbm %s1764_s29, %s1746_s26  ;;  %p1775_p8 = scmp.lt.s32.totalorder %s1764_s29, %s2926_s2 }
 0x27b   : > { %p1771_p4 = scmp.ne.s32.totalorder %s1764_s29, %s1770_s30  ;;  %p1776_p9 = scmp.lt.s32.totalorder %s1774_s7, %s1770_s30 }
 0x27d   : > { %p1772_p5 = pnand %p1771_p4, %p2872_p12  ;;  %p1777_p10 = por %p1776_p9, %p1775_p8 }
 0x27f   : > { %p1773_p7 = pneg %p1772_p5 }
 0x281   : > { %p1778_p11 = pnand %p1777_p10, %p1773_p7 }
 0x283   : > { %1781 = shalt.err (!%p1778_p11)
}
 0x284   : > { %s1820_s17 = smov 512   ;;  %s1821_s19 = smov 32  }
 0x285   : > { %1434 = dma.vmem_to_hbm [thread:$0]  (%p2872_p12), %s2881_s22, %s1674_s24, %s2883_s23, %s2863_s4, %s1820_s17, %s1820_s17, %s1821_s19  }
 0x286 PF: > { %p1686_p13 = scmp.ge.s32.totalorder %s1817_s12, 2  ;;  %s1443_s21 = sand.u32 1, %s1805_s9  }
 0x287   : > { %s1444_s25 = scalar_lea.sflag [#allocation3], %s1443_s21 }
 0x288   : > { %p1683_p0 = pnand %p1686_p13, %p1879_p6 }
 0x28a   : > { %p1684_p1 = pneg %p1683_p0 }
 0x28c   : > { %1800 = dma.done.wait (%p1684_p1), %s1444_s25, 1024  }
 0x28d   : > { %1802 = vsyncadd (%p1684_p1), %s1444_s25, 4294966272  ;;  %p12_p2 = scmp.ge.s32.totalorder %s1862_s15, 5   ;;  %s2983_s9 = smov %s1809_s10 }
 0x28e   : > { %s2984_s10 = smov %s1813_s11  ;;  %s2985_s11 = smov %s1873_s18 }
 0x28f   : > { %s2986_s12 = smov %s1862_s15  ;;  %14 = sbr.rel (!%p12_p2) target bundleno = 3 (0x3), region = 70 }
 0x294   :  { %1450 = vsyncpa [#allocation3], 1 }
 0x295   :  { %1452 = vsyncpa [#allocation3 + $0x1], 1 }

</bundles_post_ra>
